<compile_context>
chip_gen: v6e
topology: v6e:2x2x1
jax: 0.10.0
libtpu: 0.0.40
codegen_flags: <defaults>
</compile_context>

<pallas_src>
import functools
import math

import jax
import jax.numpy as jnp
from jax.experimental import pallas as pl
from jax.experimental.pallas import tpu as pltpu


_MXU_MIN_CHANNELS = 64   # below this the 1x1 conv runs on the VPU, not the MXU


def _same_pad(size, stride, k=3, dilation=1):
    """TF 'SAME' padding (out, before, after), exactly as in Conv2d_tf.forward."""
    eff = (k - 1) * dilation + 1
    out = (size + stride - 1) // stride
    pad = max(0, (out - 1) * stride + eff - size)
    before = pad // 2
    return out, before, pad - before


def _conv_dw_kernel(x_ref, dw_w_ref, dw_b_ref, pw_w_ref, pw_b_ref, o_ref, *,
                    taps, w_p, use_mxu):
    # x_ref  : (s*s, th + 2//s, wd, Cin) bf16  parity-deinterleaved padded rows
    #          for one (batch, row-tile) grid step:
    #          x_ref[p, r, c, :] == padded_input[r*s + p//s, c*s + p%s, :]
    # dw_w   : (9, 1, Cin)      f32  depthwise filter, BN scale folded in
    # dw_b   : (1, Cin)         f32  folded BN bias after the depthwise conv
    # pw_w   : (Cin, Cout_p)    f32 (VPU path) / bf16 (MXU path), BN folded
    # pw_b   : (1, Cout_p)      f32  folded BN bias after the pointwise conv
    # o_ref  : (th, w_p*Cout_p) bf16 lane-fused (w, c) output
    th = o_ref.shape[0]
    c_in = x_ref.shape[-1]
    c_out_p = pw_w_ref.shape[-1]

    # Depthwise 3x3: 9 taps. dy selects a leading-dim row window (cheap), dx a
    # parity plane + a small static contiguous column offset. The weight block
    # is read once (no per-tap ref-read/broadcast rebuild) and the accumulator
    # starts from the first tap's product (no zero-fill + add). f32 on the VPU.
    w9 = dw_w_ref[...]                                               # (9,1,Cin)
    k0, p0, ro0, co0 = taps[0]
    acc = x_ref[p0, ro0:ro0 + th, co0:co0 + w_p, :].astype(jnp.float32) * w9[k0]
    for k, p, ro, co in taps[1:]:
        acc = acc + x_ref[p, ro:ro + th, co:co + w_p, :].astype(jnp.float32) * w9[k]

    # BN scale already folded into dw_w -> only bias + ReLU6 here.
    hmid = jnp.clip(acc + dw_b_ref[...], 0.0, 6.0)                   # (th,w_p,Cin)

    if use_mxu:
        # Pointwise 1x1 == channel matmul on the MXU (bf16 in, f32 acc).
        # w_p is padded to a multiple of 8 by the wrapper so this merge is
        # layout-free.
        flat = hmid.reshape(th * w_p, c_in).astype(jnp.bfloat16)
        out = jnp.dot(flat, pw_w_ref[...], preferred_element_type=jnp.float32)
    else:
        # Tiny channel counts: the MXU contraction would be ~97% empty, so do
        # the 1x1 conv as Cin broadcast multiply-adds on the VPU in f32.
        pw = pw_w_ref[...]                                           # (Cin,Cout_p)
        out = hmid[:, :, 0:1] * pw[0:1]
        for ci in range(1, c_in):
            out = out + hmid[:, :, ci:ci + 1] * pw[ci:ci + 1]

    out = jnp.clip(out + pw_b_ref[...], 0.0, 6.0)
    # Lane-dense bf16 store: (w, c) fused onto the lane axis; the wrapper pads
    # Cout so this is a multiple of 128 lanes whenever that is cheap.
    o_ref[...] = out.reshape(th, w_p * c_out_p).astype(o_ref.dtype)


def _fold_bn(bn, eps):
    gamma, beta, mean, var = bn
    scale = gamma / jnp.sqrt(var + eps)
    return scale, beta - mean * scale


def _vmem_budgets():
    """(working-set budget, vmem_limit_bytes), tuned per TPU generation."""
    cap = None
    try:
        cap = getattr(pltpu.get_tpu_info(), "vmem_capacity_bytes", None)
    except Exception:
        cap = None   # introspection unavailable -> stay conservative
    if cap is not None and cap > 80 * 1024 * 1024:
        # v5e / v6e: 128 MiB physical VMEM -> let the row tile grow.
        return 48 * 1024 * 1024, 96 * 1024 * 1024
    # v7x (64 MiB per TensorCore) or unknown: keep headroom for double buffers.
    return 20 * 1024 * 1024, 48 * 1024 * 1024


def _pick_tile_rows(h_out, w_p, wd, c_in, lane_out, s, budget):
    """Largest output-row tile whose estimated VMEM working set fits `budget`."""
    ro_max = 2 // s
    th = min(h_out, 64)
    while th > 1:
        vmem = (2 * (s * s) * (th + ro_max) * wd * c_in * 2   # bf16 in, 2 buffers
                + 2 * th * lane_out * 2                       # bf16 out, 2 buffers
                + 3 * th * w_p * c_in * 4                     # tap / acc / hmid f32
                + 2 * th * lane_out * 4)                      # f32 out + relayout
        if vmem <= budget:
            break
        th = th - 8 if th > 8 else th - 1
    return max(th, 1)


def conv_dw_forward(x_nchw, dw_weight, dw_bn, pw_weight, pw_bn, stride,
                    eps=1e-5, out_dtype=jnp.float32):
    """Forward of _conv_dw (eval-mode BatchNorm folded into the convs).

    x_nchw    : (N, Cin, H, W) float32
    dw_weight : (Cin, 1, 3, 3)    PyTorch depthwise conv weight
    dw_bn     : (gamma, beta, mean, var), each (Cin,)
    pw_weight : (Cout, Cin, 1, 1) PyTorch pointwise conv weight
    pw_bn     : (gamma, beta, mean, var), each (Cout,)

    The kernel computes with bf16 activations and writes bf16; pass
    out_dtype=jnp.bfloat16 to skip the final cast when the downstream block
    consumes bf16 (results differ from the f32 PyTorch module at ~1e-2 level).
    """
    s = int(stride)
    assert s in (1, 2), "MobileNet _conv_dw uses stride 1 or 2"
    n, c_in, hh, ww = x_nchw.shape
    c_out = pw_weight.shape[0]

    h_out, pt, _ = _same_pad(hh, s)
    w_out, wl, _ = _same_pad(ww, s)
    ro_max = co_max = 2 // s              # halo rows / in-kernel column offsets

    use_mxu = min(c_in, c_out) >= _MXU_MIN_CHANNELS
    # MXU path: pad the output width to a multiple of 8 so the in-kernel
    # (th, w, C) -> (th*w, C) merge is layout-free (MobileNet's w=7 stages).
    w_p = (-(-w_out // 8) * 8) if use_mxu else w_out
    # Pad Cout so the fused (w, c) output lane dim is a multiple of 128
    # (unmasked stores) whenever that costs at most 2x the channels.
    q = 128 // math.gcd(w_p, 128)
    c_out_p = -(-c_out // q) * q
    if c_out_p > 2 * c_out:
        c_out_p = c_out
    lane_out = w_p * c_out_p

    wd = w_p + co_max                     # deinterleaved width incl. halo
    budget, vmem_limit = _vmem_budgets()
    th = _pick_tile_rows(h_out, w_p, wd, c_in, lane_out, s, budget)
    n_t = -(-h_out // th)
    if n * n_t < 2 and h_out > 1:         # give the second v7x TensorCore work
        th = -(-h_out // 2)
        n_t = -(-h_out // th)
    th_rows = th + ro_max
    hd = n_t * th + ro_max                # deinterleaved rows incl. halo

    # ---- glue: NCHW -> NHWC, bf16, one fused pad (SAME + halo/tile round-up) --
    x = jnp.transpose(x_nchw, (0, 2, 3, 1)).astype(jnp.bfloat16)
    xp = jnp.pad(x, ((0, 0), (pt, s * hd - hh - pt),
                     (wl, s * wd - ww - wl), (0, 0)))

    # ---- parity-deinterleave (identity / no extra pass for stride=1) ---------
    # x_d[n, p, r, c, ch] == xp[n, r*s + p//s, c*s + p%s, ch]
    if s == 1:
        x_d = xp[:, None]
    else:
        x_d = (xp.reshape(n, hd, s, wd, s, c_in)
                 .transpose(0, 2, 4, 1, 3, 5)
                 .reshape(n, s * s, hd, wd, c_in))
    if n_t == 1:
        x_t = x_d                          # no halo restaging pass needed
    else:
        # TODO(synk): for very large images replace this halo materialisation
        # with a memory_space=pl.ANY input + manual make_async_copy.
        x_t = jnp.stack([x_d[:, :, t * th:t * th + th_rows] for t in range(n_t)],
                        axis=1).reshape(n * n_t, s * s, th_rows, wd, c_in)

    # ---- fold BN (eval) into conv weights + per-channel bias ------------------
    dw_scale, dw_bias = _fold_bn(dw_bn, eps)
    pw_scale, pw_bias = _fold_bn(pw_bn, eps)
    dw_w = (jnp.transpose(dw_weight[:, 0, :, :], (1, 2, 0)) * dw_scale)   # (3,3,Cin)
    dw_w = dw_w.reshape(9, 1, c_in).astype(jnp.float32)
    dw_b = dw_bias.reshape(1, c_in).astype(jnp.float32)
    pw_w = jnp.transpose(pw_weight[:, :, 0, 0], (1, 0)) * pw_scale        # (Cin,Cout)
    pw_w = jnp.pad(pw_w, ((0, 0), (0, c_out_p - c_out)))
    pw_w = pw_w.astype(jnp.bfloat16 if use_mxu else jnp.float32)
    pw_b = jnp.pad(pw_bias, (0, c_out_p - c_out)).reshape(1, c_out_p)
    pw_b = pw_b.astype(jnp.float32)

    # tap (dy, dx) -> (weight row, parity plane, row offset, column offset)
    taps = tuple((dy * 3 + dx, (dy % s) * s + (dx % s), dy // s, dx // s)
                 for dy in range(3) for dx in range(3))
    kernel = functools.partial(_conv_dw_kernel, taps=taps, w_p=w_p,
                               use_mxu=use_mxu)

    flops = 2 * n * n_t * th * w_p * c_in * (9 + c_out_p)
    bytes_accessed = (x_t.size * 2 + n * n_t * th * lane_out * 2
                      + dw_w.size * 4 + dw_b.size * 4
                      + pw_w.size * pw_w.dtype.itemsize + pw_b.size * 4)
    cost = pl.CostEstimate(flops=int(flops), transcendentals=0,
                           bytes_accessed=int(bytes_accessed))

    def _full_spec(shape):
        if len(shape) == 2:
            return pl.BlockSpec(shape, lambda i: (0, 0))
        return pl.BlockSpec(shape, lambda i: (0, 0, 0))

    out = pl.pallas_call(
        kernel,
        out_shape=jax.ShapeDtypeStruct((n * n_t, th, lane_out), jnp.bfloat16),
        grid_spec=pltpu.PrefetchScalarGridSpec(
            num_scalar_prefetch=0,
            grid=(n * n_t,),               # merged batch x row-tile axis
            in_specs=[pl.BlockSpec((None, s * s, th_rows, wd, c_in),
                                   lambda i: (i, 0, 0, 0, 0)),
                      _full_spec((9, 1, c_in)),
                      _full_spec((1, c_in)),
                      _full_spec((c_in, c_out_p)),
                      _full_spec((1, c_out_p))],
            out_specs=pl.BlockSpec((None, th, lane_out), lambda i: (i, 0, 0))),
        compiler_params=pltpu.CompilerParams(
            dimension_semantics=("parallel",),
            vmem_limit_bytes=vmem_limit),
        cost_estimate=cost,
    )(x_t, dw_w, dw_b, pw_w, pw_b)

    # ---- glue: drop row/width/channel padding, NHWC -> NCHW -------------------
    out = out.reshape(n, n_t * th, w_p, c_out_p)[:, :h_out, :w_out, :c_out]
    return jnp.transpose(out, (0, 3, 1, 2)).astype(out_dtype)


def _reference(x_nchw, dw_weight, dw_bn, pw_weight, pw_bn, stride, eps=1e-5):
    """Pure-JAX f32 reference with the module's math (sanity check)."""
    n, c_in, h, w = x_nchw.shape
    x = jnp.transpose(x_nchw, (0, 2, 3, 1)).astype(jnp.float32)
    h_out, pt, pb = _same_pad(h, stride)
    w_out, wl, wr = _same_pad(w, stride)
    xp = jnp.pad(x, ((0, 0), (pt, pb), (wl, wr), (0, 0)))
    dw_w = jnp.transpose(dw_weight[:, 0, :, :], (1, 2, 0))
    acc = jnp.zeros((n, h_out, w_out, c_in), jnp.float32)
    for dy in range(3):
        for dx in range(3):
            patch = xp[:, dy:dy + stride * (h_out - 1) + 1:stride,
                       dx:dx + stride * (w_out - 1) + 1:stride, :]
            acc = acc + patch * dw_w[dy, dx, :]
    g, b, m, v = dw_bn
    hmid = jnp.clip((acc - m) / jnp.sqrt(v + eps) * g + b, 0.0, 6.0)
    pw_w = jnp.transpose(pw_weight[:, :, 0, 0], (1, 0))
    out = jnp.einsum("nhwc,co->nhwo", hmid, pw_w)
    g, b, m, v = pw_bn
    out = jnp.clip((out - m) / jnp.sqrt(v + eps) * g + b, 0.0, 6.0)
    return jnp.transpose(out, (0, 3, 1, 2))


def _make_params(key, c_in, c_out):
    ks = jax.random.split(key, 9)
    dw_weight = jax.random.normal(ks[0], (c_in, 1, 3, 3), jnp.float32) * 0.3
    pw_weight = jax.random.normal(ks[1], (c_out, c_in, 1, 1), jnp.float32) * (0.6 / c_in ** 0.5)
    dw_bn = (1.0 + 0.1 * jax.random.normal(ks[2], (c_in,), jnp.float32),
             0.1 * jax.random.normal(ks[3], (c_in,), jnp.float32),
             0.1 * jax.random.normal(ks[4], (c_in,), jnp.float32),
             1.0 + 0.1 * jnp.abs(jax.random.normal(ks[5], (c_in,), jnp.float32)))
    pw_bn = (1.0 + 0.1 * jax.random.normal(ks[6], (c_out,), jnp.float32),
             0.1 * jax.random.normal(ks[7], (c_out,), jnp.float32),
             0.1 * jax.random.normal(ks[8], (c_out,), jnp.float32),
             jnp.ones((c_out,), jnp.float32))
    return dw_weight, dw_bn, pw_weight, pw_bn


def _check(name, x, params, stride):
    dw_weight, dw_bn, pw_weight, pw_bn = params
    y = conv_dw_forward(x, dw_weight, dw_bn, pw_weight, pw_bn, stride)
    y = jax.block_until_ready(y)
    y_ref = _reference(x, dw_weight, dw_bn, pw_weight, pw_bn, stride)
    n, _, h, w = x.shape
    c_out = pw_weight.shape[0]
    expect = (n, c_out, (h + stride - 1) // stride, (w + stride - 1) // stride)
    assert y.shape == expect, (name, y.shape, expect)
    # bf16 activation / bf16 output path -> relaxed tolerance vs. the f32 ref.
    err = float(jnp.max(jnp.abs(y - y_ref)))
    assert jnp.allclose(y, y_ref, atol=1e-1, rtol=1e-1), (name, err)


if __name__ == "__main__":
    key = jax.random.PRNGKey(0)
    kx, kw, kp1, kp2 = jax.random.split(key, 4)

    # Small shapes consistent with _conv_dw(inp=4, oup=8, stride=2): VPU
    # pointwise path, lane-fused (w*c) output padded to 128 lanes.
    x_small = jax.random.normal(kx, (2, 4, 16, 16), jnp.float32)
    params_small = _make_params(kp1, 4, 8)
    _check("stride2_vpu", x_small, params_small, stride=2)
    # Same tensors through the stride=1 path (fused lane dim already 128).
    _check("stride1_vpu", x_small, params_small, stride=1)

    # Wider channels (still small spatially) to exercise the bf16 MXU 1x1 path.
    x_wide = jax.random.normal(kw, (2, 64, 8, 8), jnp.float32)
    params_wide = _make_params(kp2, 64, 64)
    _check("stride1_mxu", x_wide, params_wide, stride=1)

    print("KERNEL_OK")
</pallas_src>

<mosaic_0001>
module attributes {stable_mosaic.version = 11 : i64} {
  func.func @_conv_dw_kernel(%arg0: i32, %arg1: memref<1x4x9x9x4xbf16, #tpu.memory_space<vmem>>, %arg2: memref<9x1x4xf32, #tpu.memory_space<vmem>>, %arg3: memref<1x4xf32, #tpu.memory_space<vmem>>, %arg4: memref<4x16xf32, #tpu.memory_space<vmem>>, %arg5: memref<1x16xf32, #tpu.memory_space<vmem>>, %arg6: memref<1x8x128xbf16, #tpu.memory_space<vmem>>) attributes {dimension_semantics = [#tpu.dimension_semantics<parallel>], iteration_bounds = array<i64: 2>, scalar_prefetch = 0 : i64, scratch_operands = 0 : i64, tpu.core_type = #tpu.core_type<tc>, window_params = [{transform_indices = @transform_0, window_bounds = array<i64: 1, 4, 9, 9, 4>}, {pipeline_mode = #tpu.pipeline_mode<synchronous>, transform_indices = @transform_1, window_bounds = array<i64: 9, 1, 4>}, {pipeline_mode = #tpu.pipeline_mode<synchronous>, transform_indices = @transform_2, window_bounds = array<i64: 1, 4>}, {pipeline_mode = #tpu.pipeline_mode<synchronous>, transform_indices = @transform_3, window_bounds = array<i64: 4, 16>}, {pipeline_mode = #tpu.pipeline_mode<synchronous>, transform_indices = @transform_4, window_bounds = array<i64: 1, 16>}, {transform_indices = @transform_5, window_bounds = array<i64: 1, 8, 128>}]} {
    %c0 = arith.constant 0 : index
    %c0_0 = arith.constant 0 : index
    %c0_1 = arith.constant 0 : index
    %0 = vector.load %arg2[%c0, %c0_0, %c0_1] : memref<9x1x4xf32, #tpu.memory_space<vmem>>, vector<9x1x4xf32>
    %c0_2 = arith.constant 0 : index
    %c0_3 = arith.constant 0 : index
    %c0_4 = arith.constant 0 : index
    %c0_5 = arith.constant 0 : index
    %c0_6 = arith.constant 0 : index
    %1 = vector.load %arg1[%c0_2, %c0_3, %c0_4, %c0_5, %c0_6] : memref<1x4x9x9x4xbf16, #tpu.memory_space<vmem>>, vector<1x1x8x8x4xbf16>
    %2 = vector.shape_cast %1 : vector<1x1x8x8x4xbf16> to vector<8x8x4xbf16>
    %3 = arith.extf %2 : vector<8x8x4xbf16> to vector<8x8x4xf32>
    %4 = vector.extract_strided_slice %0 {offsets = [0, 0, 0], sizes = [1, 1, 4], strides = [1, 1, 1]} : vector<9x1x4xf32> to vector<1x1x4xf32>
    %5 = vector.shape_cast %4 : vector<1x1x4xf32> to vector<1x4xf32>
    %6 = vector.shape_cast %5 : vector<1x4xf32> to vector<1x1x4xf32>
    %7 = vector.broadcast %6 : vector<1x1x4xf32> to vector<8x8x4xf32>
    %8 = arith.mulf %3, %7 : vector<8x8x4xf32>
    %c0_7 = arith.constant 0 : index
    %c1 = arith.constant 1 : index
    %c0_8 = arith.constant 0 : index
    %c0_9 = arith.constant 0 : index
    %c0_10 = arith.constant 0 : index
    %9 = vector.load %arg1[%c0_7, %c1, %c0_8, %c0_9, %c0_10] : memref<1x4x9x9x4xbf16, #tpu.memory_space<vmem>>, vector<1x1x8x8x4xbf16>
    %10 = vector.shape_cast %9 : vector<1x1x8x8x4xbf16> to vector<8x8x4xbf16>
    %11 = arith.extf %10 : vector<8x8x4xbf16> to vector<8x8x4xf32>
    %12 = vector.extract_strided_slice %0 {offsets = [1, 0, 0], sizes = [1, 1, 4], strides = [1, 1, 1]} : vector<9x1x4xf32> to vector<1x1x4xf32>
    %13 = vector.shape_cast %12 : vector<1x1x4xf32> to vector<1x4xf32>
    %14 = vector.shape_cast %13 : vector<1x4xf32> to vector<1x1x4xf32>
    %15 = vector.broadcast %14 : vector<1x1x4xf32> to vector<8x8x4xf32>
    %16 = arith.mulf %11, %15 : vector<8x8x4xf32>
    %17 = arith.addf %8, %16 : vector<8x8x4xf32>
    %c0_11 = arith.constant 0 : index
    %c0_12 = arith.constant 0 : index
    %c0_13 = arith.constant 0 : index
    %c1_14 = arith.constant 1 : index
    %c0_15 = arith.constant 0 : index
    %18 = vector.load %arg1[%c0_11, %c0_12, %c0_13, %c1_14, %c0_15] : memref<1x4x9x9x4xbf16, #tpu.memory_space<vmem>>, vector<1x1x8x8x4xbf16>
    %19 = vector.shape_cast %18 : vector<1x1x8x8x4xbf16> to vector<8x8x4xbf16>
    %20 = arith.extf %19 : vector<8x8x4xbf16> to vector<8x8x4xf32>
    %21 = vector.extract_strided_slice %0 {offsets = [2, 0, 0], sizes = [1, 1, 4], strides = [1, 1, 1]} : vector<9x1x4xf32> to vector<1x1x4xf32>
    %22 = vector.shape_cast %21 : vector<1x1x4xf32> to vector<1x4xf32>
    %23 = vector.shape_cast %22 : vector<1x4xf32> to vector<1x1x4xf32>
    %24 = vector.broadcast %23 : vector<1x1x4xf32> to vector<8x8x4xf32>
    %25 = arith.mulf %20, %24 : vector<8x8x4xf32>
    %26 = arith.addf %17, %25 : vector<8x8x4xf32>
    %c0_16 = arith.constant 0 : index
    %c2 = arith.constant 2 : index
    %c0_17 = arith.constant 0 : index
    %c0_18 = arith.constant 0 : index
    %c0_19 = arith.constant 0 : index
    %27 = vector.load %arg1[%c0_16, %c2, %c0_17, %c0_18, %c0_19] : memref<1x4x9x9x4xbf16, #tpu.memory_space<vmem>>, vector<1x1x8x8x4xbf16>
    %28 = vector.shape_cast %27 : vector<1x1x8x8x4xbf16> to vector<8x8x4xbf16>
    %29 = arith.extf %28 : vector<8x8x4xbf16> to vector<8x8x4xf32>
    %30 = vector.extract_strided_slice %0 {offsets = [3, 0, 0], sizes = [1, 1, 4], strides = [1, 1, 1]} : vector<9x1x4xf32> to vector<1x1x4xf32>
    %31 = vector.shape_cast %30 : vector<1x1x4xf32> to vector<1x4xf32>
    %32 = vector.shape_cast %31 : vector<1x4xf32> to vector<1x1x4xf32>
    %33 = vector.broadcast %32 : vector<1x1x4xf32> to vector<8x8x4xf32>
    %34 = arith.mulf %29, %33 : vector<8x8x4xf32>
    %35 = arith.addf %26, %34 : vector<8x8x4xf32>
    %c0_20 = arith.constant 0 : index
    %c3 = arith.constant 3 : index
    %c0_21 = arith.constant 0 : index
    %c0_22 = arith.constant 0 : index
    %c0_23 = arith.constant 0 : index
    %36 = vector.load %arg1[%c0_20, %c3, %c0_21, %c0_22, %c0_23] : memref<1x4x9x9x4xbf16, #tpu.memory_space<vmem>>, vector<1x1x8x8x4xbf16>
    %37 = vector.shape_cast %36 : vector<1x1x8x8x4xbf16> to vector<8x8x4xbf16>
    %38 = arith.extf %37 : vector<8x8x4xbf16> to vector<8x8x4xf32>
    %39 = vector.extract_strided_slice %0 {offsets = [4, 0, 0], sizes = [1, 1, 4], strides = [1, 1, 1]} : vector<9x1x4xf32> to vector<1x1x4xf32>
    %40 = vector.shape_cast %39 : vector<1x1x4xf32> to vector<1x4xf32>
    %41 = vector.shape_cast %40 : vector<1x4xf32> to vector<1x1x4xf32>
    %42 = vector.broadcast %41 : vector<1x1x4xf32> to vector<8x8x4xf32>
    %43 = arith.mulf %38, %42 : vector<8x8x4xf32>
    %44 = arith.addf %35, %43 : vector<8x8x4xf32>
    %c0_24 = arith.constant 0 : index
    %c2_25 = arith.constant 2 : index
    %c0_26 = arith.constant 0 : index
    %c1_27 = arith.constant 1 : index
    %c0_28 = arith.constant 0 : index
    %45 = vector.load %arg1[%c0_24, %c2_25, %c0_26, %c1_27, %c0_28] : memref<1x4x9x9x4xbf16, #tpu.memory_space<vmem>>, vector<1x1x8x8x4xbf16>
    %46 = vector.shape_cast %45 : vector<1x1x8x8x4xbf16> to vector<8x8x4xbf16>
    %47 = arith.extf %46 : vector<8x8x4xbf16> to vector<8x8x4xf32>
    %48 = vector.extract_strided_slice %0 {offsets = [5, 0, 0], sizes = [1, 1, 4], strides = [1, 1, 1]} : vector<9x1x4xf32> to vector<1x1x4xf32>
    %49 = vector.shape_cast %48 : vector<1x1x4xf32> to vector<1x4xf32>
    %50 = vector.shape_cast %49 : vector<1x4xf32> to vector<1x1x4xf32>
    %51 = vector.broadcast %50 : vector<1x1x4xf32> to vector<8x8x4xf32>
    %52 = arith.mulf %47, %51 : vector<8x8x4xf32>
    %53 = arith.addf %44, %52 : vector<8x8x4xf32>
    %c0_29 = arith.constant 0 : index
    %c0_30 = arith.constant 0 : index
    %c1_31 = arith.constant 1 : index
    %c0_32 = arith.constant 0 : index
    %c0_33 = arith.constant 0 : index
    %54 = vector.load %arg1[%c0_29, %c0_30, %c1_31, %c0_32, %c0_33] : memref<1x4x9x9x4xbf16, #tpu.memory_space<vmem>>, vector<1x1x8x8x4xbf16>
    %55 = vector.shape_cast %54 : vector<1x1x8x8x4xbf16> to vector<8x8x4xbf16>
    %56 = arith.extf %55 : vector<8x8x4xbf16> to vector<8x8x4xf32>
    %57 = vector.extract_strided_slice %0 {offsets = [6, 0, 0], sizes = [1, 1, 4], strides = [1, 1, 1]} : vector<9x1x4xf32> to vector<1x1x4xf32>
    %58 = vector.shape_cast %57 : vector<1x1x4xf32> to vector<1x4xf32>
    %59 = vector.shape_cast %58 : vector<1x4xf32> to vector<1x1x4xf32>
    %60 = vector.broadcast %59 : vector<1x1x4xf32> to vector<8x8x4xf32>
    %61 = arith.mulf %56, %60 : vector<8x8x4xf32>
    %62 = arith.addf %53, %61 : vector<8x8x4xf32>
    %c0_34 = arith.constant 0 : index
    %c1_35 = arith.constant 1 : index
    %c1_36 = arith.constant 1 : index
    %c0_37 = arith.constant 0 : index
    %c0_38 = arith.constant 0 : index
    %63 = vector.load %arg1[%c0_34, %c1_35, %c1_36, %c0_37, %c0_38] : memref<1x4x9x9x4xbf16, #tpu.memory_space<vmem>>, vector<1x1x8x8x4xbf16>
    %64 = vector.shape_cast %63 : vector<1x1x8x8x4xbf16> to vector<8x8x4xbf16>
    %65 = arith.extf %64 : vector<8x8x4xbf16> to vector<8x8x4xf32>
    %66 = vector.extract_strided_slice %0 {offsets = [7, 0, 0], sizes = [1, 1, 4], strides = [1, 1, 1]} : vector<9x1x4xf32> to vector<1x1x4xf32>
    %67 = vector.shape_cast %66 : vector<1x1x4xf32> to vector<1x4xf32>
    %68 = vector.shape_cast %67 : vector<1x4xf32> to vector<1x1x4xf32>
    %69 = vector.broadcast %68 : vector<1x1x4xf32> to vector<8x8x4xf32>
    %70 = arith.mulf %65, %69 : vector<8x8x4xf32>
    %71 = arith.addf %62, %70 : vector<8x8x4xf32>
    %c0_39 = arith.constant 0 : index
    %c0_40 = arith.constant 0 : index
    %c1_41 = arith.constant 1 : index
    %c1_42 = arith.constant 1 : index
    %c0_43 = arith.constant 0 : index
    %72 = vector.load %arg1[%c0_39, %c0_40, %c1_41, %c1_42, %c0_43] : memref<1x4x9x9x4xbf16, #tpu.memory_space<vmem>>, vector<1x1x8x8x4xbf16>
    %73 = vector.shape_cast %72 : vector<1x1x8x8x4xbf16> to vector<8x8x4xbf16>
    %74 = arith.extf %73 : vector<8x8x4xbf16> to vector<8x8x4xf32>
    %75 = vector.extract_strided_slice %0 {offsets = [8, 0, 0], sizes = [1, 1, 4], strides = [1, 1, 1]} : vector<9x1x4xf32> to vector<1x1x4xf32>
    %76 = vector.shape_cast %75 : vector<1x1x4xf32> to vector<1x4xf32>
    %77 = vector.shape_cast %76 : vector<1x4xf32> to vector<1x1x4xf32>
    %78 = vector.broadcast %77 : vector<1x1x4xf32> to vector<8x8x4xf32>
    %79 = arith.mulf %74, %78 : vector<8x8x4xf32>
    %80 = arith.addf %71, %79 : vector<8x8x4xf32>
    %c0_44 = arith.constant 0 : index
    %c0_45 = arith.constant 0 : index
    %81 = vector.load %arg3[%c0_44, %c0_45] : memref<1x4xf32, #tpu.memory_space<vmem>>, vector<1x4xf32>
    %82 = vector.shape_cast %81 : vector<1x4xf32> to vector<1x1x4xf32>
    %83 = vector.broadcast %82 : vector<1x1x4xf32> to vector<8x8x4xf32>
    %84 = arith.addf %80, %83 : vector<8x8x4xf32>
    %cst = arith.constant 0.000000e+00 : f32
    %cst_46 = arith.constant 6.000000e+00 : f32
    %85 = vector.broadcast %cst : f32 to vector<8x8x4xf32>
    %86 = arith.maximumf %85, %84 : vector<8x8x4xf32>
    %87 = vector.broadcast %cst_46 : f32 to vector<8x8x4xf32>
    %88 = arith.minimumf %87, %86 : vector<8x8x4xf32>
    %c0_47 = arith.constant 0 : index
    %c0_48 = arith.constant 0 : index
    %89 = vector.load %arg4[%c0_47, %c0_48] : memref<4x16xf32, #tpu.memory_space<vmem>>, vector<4x16xf32>
    %90 = vector.extract_strided_slice %88 {offsets = [0, 0, 0], sizes = [8, 8, 1], strides = [1, 1, 1]} : vector<8x8x4xf32> to vector<8x8x1xf32>
    %91 = vector.extract_strided_slice %89 {offsets = [0, 0], sizes = [1, 16], strides = [1, 1]} : vector<4x16xf32> to vector<1x16xf32>
    %92 = vector.shape_cast %91 : vector<1x16xf32> to vector<1x1x16xf32>
    %93 = vector.broadcast %90 : vector<8x8x1xf32> to vector<8x8x16xf32>
    %94 = vector.broadcast %92 : vector<1x1x16xf32> to vector<8x8x16xf32>
    %95 = arith.mulf %93, %94 : vector<8x8x16xf32>
    %96 = vector.extract_strided_slice %88 {offsets = [0, 0, 1], sizes = [8, 8, 1], strides = [1, 1, 1]} : vector<8x8x4xf32> to vector<8x8x1xf32>
    %97 = vector.extract_strided_slice %89 {offsets = [1, 0], sizes = [1, 16], strides = [1, 1]} : vector<4x16xf32> to vector<1x16xf32>
    %98 = vector.shape_cast %97 : vector<1x16xf32> to vector<1x1x16xf32>
    %99 = vector.broadcast %96 : vector<8x8x1xf32> to vector<8x8x16xf32>
    %100 = vector.broadcast %98 : vector<1x1x16xf32> to vector<8x8x16xf32>
    %101 = arith.mulf %99, %100 : vector<8x8x16xf32>
    %102 = arith.addf %95, %101 : vector<8x8x16xf32>
    %103 = vector.extract_strided_slice %88 {offsets = [0, 0, 2], sizes = [8, 8, 1], strides = [1, 1, 1]} : vector<8x8x4xf32> to vector<8x8x1xf32>
    %104 = vector.extract_strided_slice %89 {offsets = [2, 0], sizes = [1, 16], strides = [1, 1]} : vector<4x16xf32> to vector<1x16xf32>
    %105 = vector.shape_cast %104 : vector<1x16xf32> to vector<1x1x16xf32>
    %106 = vector.broadcast %103 : vector<8x8x1xf32> to vector<8x8x16xf32>
    %107 = vector.broadcast %105 : vector<1x1x16xf32> to vector<8x8x16xf32>
    %108 = arith.mulf %106, %107 : vector<8x8x16xf32>
    %109 = arith.addf %102, %108 : vector<8x8x16xf32>
    %110 = vector.extract_strided_slice %88 {offsets = [0, 0, 3], sizes = [8, 8, 1], strides = [1, 1, 1]} : vector<8x8x4xf32> to vector<8x8x1xf32>
    %111 = vector.extract_strided_slice %89 {offsets = [3, 0], sizes = [1, 16], strides = [1, 1]} : vector<4x16xf32> to vector<1x16xf32>
    %112 = vector.shape_cast %111 : vector<1x16xf32> to vector<1x1x16xf32>
    %113 = vector.broadcast %110 : vector<8x8x1xf32> to vector<8x8x16xf32>
    %114 = vector.broadcast %112 : vector<1x1x16xf32> to vector<8x8x16xf32>
    %115 = arith.mulf %113, %114 : vector<8x8x16xf32>
    %116 = arith.addf %109, %115 : vector<8x8x16xf32>
    %c0_49 = arith.constant 0 : index
    %c0_50 = arith.constant 0 : index
    %117 = vector.load %arg5[%c0_49, %c0_50] : memref<1x16xf32, #tpu.memory_space<vmem>>, vector<1x16xf32>
    %118 = vector.shape_cast %117 : vector<1x16xf32> to vector<1x1x16xf32>
    %119 = vector.broadcast %118 : vector<1x1x16xf32> to vector<8x8x16xf32>
    %120 = arith.addf %116, %119 : vector<8x8x16xf32>
    %cst_51 = arith.constant 0.000000e+00 : f32
    %cst_52 = arith.constant 6.000000e+00 : f32
    %121 = vector.broadcast %cst_51 : f32 to vector<8x8x16xf32>
    %122 = arith.maximumf %121, %120 : vector<8x8x16xf32>
    %123 = vector.broadcast %cst_52 : f32 to vector<8x8x16xf32>
    %124 = arith.minimumf %123, %122 : vector<8x8x16xf32>
    %125 = vector.shape_cast %124 : vector<8x8x16xf32> to vector<8x128xf32>
    %126 = arith.truncf %125 : vector<8x128xf32> to vector<8x128xbf16>
    %c0_53 = arith.constant 0 : index
    %c0_54 = arith.constant 0 : index
    %c0_55 = arith.constant 0 : index
    %127 = vector.load %arg6[%c0_53, %c0_54, %c0_55] : memref<1x8x128xbf16, #tpu.memory_space<vmem>>, vector<1x8x128xbf16>
    %128 = vector.shape_cast %127 : vector<1x8x128xbf16> to vector<8x128xbf16>
    %129 = vector.shape_cast %126 : vector<8x128xbf16> to vector<1x8x128xbf16>
    tpu.vector_store %arg6[%c0_53, %c0_54, %c0_55], %129 {strides = array<i32>} : memref<1x8x128xbf16, #tpu.memory_space<vmem>>, vector<1x8x128xbf16>,
    return
  }
  func.func @transform_0(%arg0: i32) -> (i32, i32, i32, i32, i32) {
    %c0_i32 = arith.constant 0 : i32
    %c0_i32_0 = arith.constant 0 : i32
    %c0_i32_1 = arith.constant 0 : i32
    %c0_i32_2 = arith.constant 0 : i32
    %c0_i32_3 = arith.constant 0 : i32
    return %arg0, %c0_i32, %c0_i32_0, %c0_i32_1, %c0_i32_2 : i32, i32, i32, i32, i32
  }
  func.func @transform_1(%arg0: i32) -> (i32, i32, i32) {
    %c0_i32 = arith.constant 0 : i32
    %c0_i32_0 = arith.constant 0 : i32
    %c0_i32_1 = arith.constant 0 : i32
    %c0_i32_2 = arith.constant 0 : i32
    return %c0_i32, %c0_i32_0, %c0_i32_1 : i32, i32, i32
  }
  func.func @transform_2(%arg0: i32) -> (i32, i32) {
    %c0_i32 = arith.constant 0 : i32
    %c0_i32_0 = arith.constant 0 : i32
    %c0_i32_1 = arith.constant 0 : i32
    return %c0_i32, %c0_i32_0 : i32, i32
  }
  func.func @transform_3(%arg0: i32) -> (i32, i32) {
    %c0_i32 = arith.constant 0 : i32
    %c0_i32_0 = arith.constant 0 : i32
    %c0_i32_1 = arith.constant 0 : i32
    return %c0_i32, %c0_i32_0 : i32, i32
  }
  func.func @transform_4(%arg0: i32) -> (i32, i32) {
    %c0_i32 = arith.constant 0 : i32
    %c0_i32_0 = arith.constant 0 : i32
    %c0_i32_1 = arith.constant 0 : i32
    return %c0_i32, %c0_i32_0 : i32, i32
  }
  func.func @transform_5(%arg0: i32) -> (i32, i32, i32) {
    %c0_i32 = arith.constant 0 : i32
    %c0_i32_0 = arith.constant 0 : i32
    %c0_i32_1 = arith.constant 0 : i32
    return %arg0, %c0_i32, %c0_i32_0 : i32, i32, i32
  }
}

</mosaic_0001>

<bundles_post_ra>
// kernel: tpu_custom_call.1
= control target key start
LH: loop header
LB: loop body
LE: loop exit
PB: predicated region body
PF: predicated region fallthrough
CT: control target
= control target key end

     0   :  { %10 = vsyncpa [#allocation3], 0  ;;  %s1899_s0 = inlined_call_operand.vmem [shape: bf16[2,4,9,9,4], index: 0, kind: input, shape index: {}]   ;;  %s1900_s1 = inlined_call_operand.vmem [shape: f32[9,1,4], index: 1, kind: input, shape index: {}]   ;;  %s1901_s2 = inlined_call_operand.vmem [shape: f32[1,4], index: 2, kind: input, shape index: {}]   ;;  %s1902_s3 = inlined_call_operand.vmem [shape: f32[4,16], index: 3, kind: input, shape index: {}]   ;;  %s1903_s4 = inlined_call_operand.vmem [shape: f32[1,16], index: 4, kind: input, shape index: {}]   ;;  %s1904_s5 = inlined_call_operand.hbm [shape: bf16[2,8,128], index: 5, kind: output, shape index: {}]  }
   0x1   :  { %12 = vsyncpa [#allocation3 + $0x1], 0  ;;  %s1508_s18 = smov 0   ;;  %s1510_s19 = smov 0  }
   0x2   :  { %s1512_s20 = smov 0   ;;  %s1514_s21 = smov 0  }
   0x3 LB: > { %s1529_s22 = sadd.s32 4294967295, %s1462_s21   ;;  %s1264_s23 = sadd.s32 4294967294, %s1462_s21   ;;  %s1462_s21 = sphi %s1514_s21, %s1910_s21   ;;  %s1458_s20 = sphi %s1512_s20, %s1909_s20   ;;  %s1454_s19 = sphi %s1510_s19, %s1908_s19   ;;  %s1450_s18 = sphi %s1508_s18, %s1907_s18  }
   0x4   : > { %s1533_s24 = sadd.s32 1, %s1462_s21   ;;  %s135_s25 = sadd.s32 1, %s1458_s20 }
   0x5   : > { %s132_s26 = ssub.s32 %s1462_s21, %s1533_s24  ;;  %p145_p0 = scmp.ne.s32.totalorder %s1458_s20, %s1454_s19 }
   0x6   : > { %p133_p1 = scmp.eq.s32.totalorder %s132_s26, 0  ;;  %p146_p2 = scmp.eq.s32.totalorder %s1529_s22, 1 }
   0x7   : > { %p151_p3 = scmp.ne.s32.totalorder %s1454_s19, %s1450_s18  ;;  %p152_p4 = scmp.eq.s32.totalorder %s1264_s23, 1 }
   0x8   : > { %s1544_s27 = scalar_select %p133_p1, %s1458_s20, %s135_s25  }
   0x9   : > { %p1546_p5 = por %p146_p2, %p145_p0  ;;  %p1550_p6 = por %p152_p4, %p151_p3 }
   0xa   : > { %p1267_p7 = scmp.ge.s32.totalorder %s1462_s21, 1  ;;  %p190_p8 = scmp.lt.s32.totalorder %s1462_s21, 3 }
   0xc   : > { %p191_p9 = pnand %p1267_p7, %p190_p8 }
   0xd   : > { %p218_p10 = scmp.lt.s32.totalorder (!%p191_p9), %s1529_s22, 1  ;;  %s1470_s23 = smov (!%p191_p9), 32  }
   0xe   : > { %194 = sbr.rel (%p191_p9) target bundleno = 455 (0x1c7), region = 40  ;;  %s1471_s25 = smov (!%p191_p9), 16  }
   0xf   : > { %s1472_s26 = smov (!%p191_p9), 64   ;;  %s1475_s7 = smov (!%p191_p9), 80  }
  0x10   : > { %s1476_s8 = smov (!%p191_p9), 112   ;;  %s215_s9 = sand.u32 (!%p191_p9), 1, %s1454_s19  }
  0x11   : > { %s1268_s10 = sshll.u32 (!%p191_p9), %s215_s9, 2  ;;  %s1338_s11 = sshll.u32 (!%p191_p9), %s1529_s22, 6 }
  0x12   : > { %s217_s12 = scalar_lea.vmem (!%p191_p9), [#allocation2], %s1268_s10  ;;  %s1203_s16 = scalar_lea.hbm (!%p191_p9), %s1904_s5, %s1338_s11 }
  0x13   : > { %v1464_v0 = vmov 0   ;;  %s219_s30 = scalar_select %p218_p10, %s1529_s22, 1  ;;  %v1561_v1 = vld [vmem:[%s1900_s1] ss:$0 sm:$0xff]  ;;  %v1566_v2 = vld [vmem:[%s1900_s1 + $0x1] ss:$0 sm:$0xff] }
  0x14   : > { %1395 = vset.pattern.permute.xlu1 %v1464_v0  ;;  %1394 = vset.pattern.permute.xlu0 %v1464_v0  ;;  %v1571_v3 = vld [vmem:[%s1900_s1 + $0x2] ss:$0 sm:$0xff]  ;;  %v1581_v4 = vld [vmem:[%s1900_s1 + $0x3] ss:$0 sm:$0xff]  ;;  %v1586_v5 = vld [vmem:[%s1900_s1 + $0x4] ss:$0 sm:$0xff] }
  0x15   : > { %s1341_s6 = smul.u32 288, %s219_s30  ;;  %vm355_vm0 = vcmask 1046528   ;;  %v1594_v9 = vld [vmem:[%s1900_s1 + $0x5] ss:$0 sm:$0xff]  ;;  %v1601_v16 = vld [vmem:[%s1900_s1 + $0x6] ss:$0 sm:$0xff] }
  0x16   : > { %v1606_v21 = vld [vmem:[%s1900_s1 + $0x7] ss:$0 sm:$0xff]  ;;  %v1616_v27 = vld [vmem:[%s1900_s1 + $0x8] ss:$0 sm:$0xff]  ;;  %s1473_s30 = smov 48   ;;  %vm1175_vm1 = vcmask 130048  }
  0x17   : > { %s1576_s15 = scalar_lea.vmem %s1899_s0, %s1341_s6  ;;  %s1474_s6 = smov 96   ;;  %vm1177_vm2 = vcmask 261120   ;;  %vm1179_vm3 = vcmask 392192   ;;  %vm1181_vm4 = vcmask 523264   ;;  %vm1183_vm5 = vcmask 654336  }
  0x18   : > { %v234_v6 = vld [vmem:[%s1576_s15 + $0x10] ss:$72 sps:$4 sm:$0xff]   ;;  %v303_v7 = vld [vmem:[%s1576_s15 + $0x14] sm:$0x1]  ;;  %v1283_v8 = vld [vmem:[%s1576_s15 + $0xa0] ss:$72 sps:$4 sm:$0xff]  }
  0x19   : > { %v242_v10 = vunpack.c.l.bf16 %v234_v6  ;;  %v273_v11 = vunpack.c.h.bf16 %v234_v6  ;;  %v311_v12 = vunpack.c.l.bf16 %v303_v7  ;;  %v407_v13 = vunpack.c.l.bf16 %v1283_v8  ;;  %v1301_v14 = vld [vmem:[%s1576_s15 + $0xa4] sm:$0x1]  ;;  %v1310_v15 = vld [vmem:[%s1576_s15 + $0x18] ss:$72 sps:$4 sm:$0xff]   ;;  %v1328_v26 = vld [vmem:[%s1576_s15 + $0x1c] sm:$0x1] }
  0x1a   : > { %v446_v17 = vunpack.c.h.bf16 %v1283_v8  ;;  %v484_v18 = vunpack.c.l.bf16 %v1301_v14  ;;  %v579_v19 = vunpack.c.l.bf16 %v1310_v15  ;;  %v618_v20 = vunpack.c.h.bf16 %v1310_v15  ;;  %v232_v32 = vld [vmem:[%s1576_s15] ss:$72 sps:$4 sm:$0xff]   ;;  %v301_v37 = vld [vmem:[%s1576_s15 + $0x4] sm:$0x1]  ;;  %v1281_v46 = vld [vmem:[%s1576_s15 + $0x90] ss:$72 sps:$4 sm:$0xff]  }
  0x1b   : > { %v256_v22 = vmul.f32 %v1561_v1, %v242_v10  ;;  %v287_v23 = vmul.f32 %v1566_v2, %v273_v11  ;;  %v327_v24 = vmul.f32 %v1571_v3, %v242_v10  ;;  %v328_v25 = vmul.f32 %v1571_v3, %v311_v12  ;;  %v1299_v51 = vld [vmem:[%s1576_s15 + $0x94] sm:$0x1]  ;;  %v1308_v60 = vld [vmem:[%s1576_s15 + $0x8] ss:$72 sps:$4 sm:$0xff]   ;;  %v1326_v6 = vld [vmem:[%s1576_s15 + $0xc] sm:$0x1] }
  0x1c   : > { %v421_v28 = vmul.f32 %v1581_v4, %v407_v13  ;;  %v460_v29 = vmul.f32 %v1586_v5, %v446_v17  ;;  %v500_v30 = vmul.f32 %v1594_v9, %v407_v13  ;;  %v501_v31 = vmul.f32 %v1594_v9, %v484_v18  ;;  %s1205_s13 = sshll.u32 %s217_s12, 4  ;;  %s1192_s17 = scalar_lea.sflag [#allocation3], %s215_s9  ;;  %s1206_s13 = int_to_ptr.vmem [resolvable:$true] %s1205_s13 }
  0x1d   : > { %v295_v33 = vadd.f32 %v287_v23, %v256_v22  ;;  %v362_v34 = vrot.slane %v327_v24, 1  ;;  %v363_v35 = vrot.slane %v328_v25, 1  ;;  %v593_v36 = vmul.f32 %v1601_v16, %v579_v19  ;;  %v235_v22 = vld [vmem:[%s1576_s15 + $0x18] ss:$72 sps:$4 sm:$0xff]  }
  0x1e   : > { %v534_v38 = vrot.slane %v500_v30, 1  ;;  %v535_v39 = vrot.slane %v501_v31, 1  ;;  %v632_v40 = vmul.f32 %v1606_v21, %v618_v20  ;;  %v656_v41 = vunpack.c.l.bf16 %v1328_v26 }
  0x1f   : > { %v364_v42 = vsel %vm355_vm0, %v362_v34, %v363_v35  ;;  %v672_v43 = vmul.f32 %v1616_v27, %v579_v19  ;;  %v240_v44 = vunpack.c.l.bf16 %v232_v32  ;;  %v271_v45 = vunpack.c.h.bf16 %v232_v32 }
  0x20   : > { %v390_v47 = vadd.f32 %v364_v42, %v295_v33  ;;  %v536_v48 = vsel %vm355_vm0, %v534_v38, %v535_v39  ;;  %v673_v49 = vmul.f32 %v1616_v27, %v656_v41  ;;  %v309_v50 = vunpack.c.l.bf16 %v301_v37  ;;  %v1284_v38 = vld [vmem:[%s1576_s15 + $0xa8] ss:$72 sps:$4 sm:$0xff]  }
  0x21   : > { %v706_v52 = vrot.slane %v672_v43, 1  ;;  %v254_v53 = vmul.f32 %v1561_v1, %v240_v44  ;;  %v285_v54 = vmul.f32 %v1566_v2, %v271_v45  ;;  %v323_v55 = vmul.f32 %v1571_v3, %v240_v44 }
  0x22   : > { %v429_v56 = vadd.f32 %v421_v28, %v390_v47  ;;  %v707_v57 = vrot.slane %v673_v49, 1  ;;  %v324_v58 = vmul.f32 %v1571_v3, %v309_v50  ;;  %v405_v59 = vunpack.c.l.bf16 %v1281_v46  ;;  %v304_v28 = vld [vmem:[%s1576_s15 + $0x1c] sm:$0x1] }
  0x23   : > { %v293_v61 = vadd.f32 %v285_v54, %v254_v53  ;;  %v356_v62 = vrot.slane %v323_v55, 1  ;;  %v444_v63 = vunpack.c.h.bf16 %v1281_v46  ;;  %v482_v0 = vunpack.c.l.bf16 %v1299_v51 }
  0x24   : > { %v468_v7 = vadd.f32 %v460_v29, %v429_v56  ;;  %v708_v8 = vsel %vm355_vm0, %v706_v52, %v707_v57  ;;  %v357_v10 = vrot.slane %v324_v58, 1  ;;  %v419_v11 = vmul.f32 %v1581_v4, %v405_v59  ;;  %v1311_v52 = vld [vmem:[%s1576_s15 + $0x20] ss:$72 sps:$4 sm:$0xff]  }
  0x25   : > { %v458_v12 = vmul.f32 %v1586_v5, %v444_v63  ;;  %v496_v13 = vmul.f32 %v1594_v9, %v405_v59  ;;  %v497_v14 = vmul.f32 %v1594_v9, %v482_v0  ;;  %v577_v15 = vunpack.c.l.bf16 %v1308_v60 }
  0x26   : > { %v562_v17 = vadd.f32 %v536_v48, %v468_v7  ;;  %v358_v18 = vsel %vm355_vm0, %v356_v62, %v357_v10  ;;  %v616_v19 = vunpack.c.h.bf16 %v1308_v60  ;;  %v654_v20 = vunpack.c.l.bf16 %v1326_v6  ;;  %v1302_v48 = vld [vmem:[%s1576_s15 + $0xac] sm:$0x1]  ;;  %v1329_v6 = vld [vmem:[%s1576_s15 + $0x24] sm:$0x1] }
  0x27   : > { %v388_v23 = vadd.f32 %v358_v18, %v293_v61  ;;  %v528_v24 = vrot.slane %v496_v13, 1  ;;  %v529_v25 = vrot.slane %v497_v14, 1  ;;  %v591_v26 = vmul.f32 %v1601_v16, %v577_v15  ;;  %v302_v18 = vld [vmem:[%s1576_s15 + $0xc] sm:$0x1] }
  0x28   : > { %v601_v29 = vadd.f32 %v593_v36, %v562_v17  ;;  %v630_v30 = vmul.f32 %v1606_v21, %v616_v19  ;;  %v668_v31 = vmul.f32 %v1616_v27, %v577_v15  ;;  %v669_v32 = vmul.f32 %v1616_v27, %v654_v20  ;;  %v1655_v36 = vld [vmem:[%s1901_s2] ss:$0 sm:$0xff] }
  0x29   : > { %v427_v33 = vadd.f32 %v419_v11, %v388_v23  ;;  %v530_v34 = vsel %vm355_vm0, %v528_v24, %v529_v25  ;;  %v243_v35 = vunpack.c.l.bf16 %v235_v22  ;;  %v274_v37 = vunpack.c.h.bf16 %v235_v22 }
  0x2a   : > { %v640_v39 = vadd.f32 %v632_v40, %v601_v29  ;;  %v700_v41 = vrot.slane %v668_v31, 1  ;;  %v701_v42 = vrot.slane %v669_v32, 1  ;;  %v312_v43 = vunpack.c.l.bf16 %v304_v28 }
  0x2b   : > { %v466_v44 = vadd.f32 %v458_v12, %v427_v33  ;;  %v257_v45 = vmul.f32 %v1561_v1, %v243_v35  ;;  %v288_v46 = vmul.f32 %v1566_v2, %v274_v37  ;;  %v329_v47 = vmul.f32 %v1571_v3, %v243_v35  ;;  %v233_v12 = vld [vmem:[%s1576_s15 + $0x8] ss:$72 sps:$4 sm:$0xff]   ;;  %v1282_v33 = vld [vmem:[%s1576_s15 + $0x98] ss:$72 sps:$4 sm:$0xff]  }
  0x2c   : > { %v734_v49 = vadd.f32 %v708_v8, %v640_v39  ;;  %v702_v50 = vsel %vm355_vm0, %v700_v41, %v701_v42  ;;  %v330_v40 = vmul.f32 %v1571_v3, %v312_v43  ;;  %v408_v51 = vunpack.c.l.bf16 %v1284_v38 }
  0x2d   : > { %v560_v53 = vadd.f32 %v530_v34, %v466_v44  ;;  %v296_v54 = vadd.f32 %v288_v46, %v257_v45  ;;  %v365_v55 = vrot.slane %v329_v47, 1  ;;  %v447_v56 = vunpack.c.h.bf16 %v1284_v38 }
  0x2e   : > { %v749_v57 = vadd.f32 %v1655_v36, %v734_v49  ;;  %v366_v58 = vrot.slane %v330_v40, 1  ;;  %v422_v59 = vmul.f32 %v1581_v4, %v408_v51  ;;  %v485_v60 = vunpack.c.l.bf16 %v1302_v48  ;;  %v1300_v48 = vld [vmem:[%s1576_s15 + $0x9c] sm:$0x1]  ;;  %v1309_v49 = vld [vmem:[%s1576_s15 + $0x10] ss:$72 sps:$4 sm:$0xff]  }
  0x2f   : > { %v599_v61 = vadd.f32 %v591_v26, %v560_v53  ;;  %v461_v62 = vmul.f32 %v1586_v5, %v447_v56  ;;  %v502_v63 = vmul.f32 %v1594_v9, %v408_v51  ;;  %v580_v0 = vunpack.c.l.bf16 %v1311_v52 }
  0x30   : > { %v757_v7 = vmax.f32 %v749_v57, 0.0  ;;  %v367_v8 = vsel %vm355_vm0, %v365_v55, %v366_v58  ;;  %v503_v10 = vmul.f32 %v1594_v9, %v485_v60  ;;  %v619_v11 = vunpack.c.h.bf16 %v1311_v52  ;;  %v1327_v52 = vld [vmem:[%s1576_s15 + $0x14] sm:$0x1] }
  0x31   : > { %v638_v13 = vadd.f32 %v630_v30, %v599_v61  ;;  %v391_v14 = vadd.f32 %v367_v8, %v296_v54  ;;  %v537_v15 = vrot.slane %v502_v63, 1  ;;  %v594_v17 = vmul.f32 %v1601_v16, %v580_v0 }
  0x32   : > { %v1674_v19 = vmin.f32 %v757_v7, 6.0  ;;  %v538_v20 = vrot.slane %v503_v10, 1  ;;  %v633_v22 = vmul.f32 %v1606_v21, %v619_v11  ;;  %v657_v23 = vunpack.c.l.bf16 %v1329_v6  ;;  %v237_v6 = vld [vmem:[%s1576_s15 + $0x28] ss:$72 sps:$4 sm:$0xff]  }
  0x33   : > { %v732_v24 = vadd.f32 %v702_v50, %v638_v13  ;;  %v430_v25 = vadd.f32 %v422_v59, %v391_v14  ;;  %v674_v26 = vmul.f32 %v1616_v27, %v580_v0  ;;  %v241_v28 = vunpack.c.l.bf16 %v233_v12 }
  0x34   : > { %784 = vperm.xlu1 %1395, %v1674_v19   ;;  %v539_v29 = vsel %vm355_vm0, %v537_v15, %v538_v20  ;;  %v675_v30 = vmul.f32 %v1616_v27, %v657_v23  ;;  %v272_v31 = vunpack.c.h.bf16 %v233_v12  ;;  %v310_v32 = vunpack.c.l.bf16 %v302_v18  ;;  %v306_v12 = vld [vmem:[%s1576_s15 + $0x2c] sm:$0x1] }
  0x35   : > { %v747_v34 = vadd.f32 %v1655_v36, %v732_v24  ;;  %v469_v35 = vadd.f32 %v461_v62, %v430_v25  ;;  %v709_v37 = vrot.slane %v674_v26, 1  ;;  %v255_v38 = vmul.f32 %v1561_v1, %v241_v28 }
  0x36   : > { %v710_v39 = vrot.slane %v675_v30, 1  ;;  %v286_v41 = vmul.f32 %v1566_v2, %v272_v31  ;;  %v325_v42 = vmul.f32 %v1571_v3, %v241_v28  ;;  %v326_v43 = vmul.f32 %v1571_v3, %v310_v32 }
  0x37   : > { %v755_v44 = vmax.f32 %v747_v34, 0.0  ;;  %v563_v45 = vadd.f32 %v539_v29, %v469_v35  ;;  %v406_v46 = vunpack.c.l.bf16 %v1282_v33  ;;  %v445_v47 = vunpack.c.h.bf16 %v1282_v33  ;;  %v1286_v29 = vld [vmem:[%s1576_s15 + $0xb8] ss:$72 sps:$4 sm:$0xff]   ;;  %v1304_v34 = vld [vmem:[%s1576_s15 + $0xbc] sm:$0x1] }
  0x38   : > { %v294_v50 = vadd.f32 %v286_v41, %v255_v38  ;;  %v359_v40 = vrot.slane %v325_v42, 1  ;;  %v360_v51 = vrot.slane %v326_v43, 1  ;;  %v711_v55 = vsel %vm355_vm0, %v709_v37, %v710_v39  ;;  %v1313_v41 = vld [vmem:[%s1576_s15 + $0x30] ss:$72 sps:$4 sm:$0xff]  }
  0x39   : > { %v1690_v53 = vmin.f32 %v755_v44, 6.0  ;;  %v602_v54 = vadd.f32 %v594_v17, %v563_v45  ;;  %v420_v56 = vmul.f32 %v1581_v4, %v406_v46  ;;  %v483_v58 = vunpack.c.l.bf16 %v1300_v48 }
  0x3a   : > { %v361_v57 = vsel %vm355_vm0, %v359_v40, %v360_v51  ;;  %v498_v59 = vmul.f32 %v1594_v9, %v406_v46  ;;  %v578_v60 = vunpack.c.l.bf16 %v1309_v49  ;;  %v459_v63 = vmul.f32 %v1586_v5, %v445_v47 }
  0x3b   : > { %774 = vperm.xlu0 %1394, %v1690_v53   ;;  %v641_v61 = vadd.f32 %v633_v22, %v602_v54  ;;  %v389_v62 = vadd.f32 %v361_v57, %v294_v50  ;;  %v655_v0 = vunpack.c.l.bf16 %v1327_v52  ;;  %v499_v7 = vmul.f32 %v1594_v9, %v483_v58  ;;  %v1331_v50 = vld [vmem:[%s1576_s15 + $0x34] sm:$0x1] }
  0x3c   : > { %v531_v8 = vrot.slane %v498_v59, 1  ;;  %v617_v10 = vunpack.c.h.bf16 %v1309_v49  ;;  %v670_v11 = vmul.f32 %v1616_v27, %v578_v60  ;;  %v592_v15 = vmul.f32 %v1601_v16, %v578_v60  ;;  %v236_v59 = vld [vmem:[%s1576_s15 + $0x20] ss:$72 sps:$4 sm:$0xff]  }
  0x3d   : > { %v735_v13 = vadd.f32 %v711_v55, %v641_v61  ;;  %v428_v14 = vadd.f32 %v420_v56, %v389_v62  ;;  %v671_v17 = vmul.f32 %v1616_v27, %v655_v0  ;;  %v532_v18 = vrot.slane %v499_v7, 1  ;;  %v305_v0 = vld [vmem:[%s1576_s15 + $0x24] sm:$0x1] }
  0x3e   : > { %v703_v20 = vrot.slane %v670_v11, 1  ;;  %v245_v22 = vunpack.c.l.bf16 %v237_v6  ;;  %v276_v23 = vunpack.c.h.bf16 %v237_v6  ;;  %v314_v28 = vunpack.c.l.bf16 %v306_v12 }
  0x3f   : > { %v750_v24 = vadd.f32 %v1655_v36, %v735_v13  ;;  %v467_v25 = vadd.f32 %v459_v63, %v428_v14  ;;  %v704_v26 = vrot.slane %v671_v17, 1  ;;  %v533_v30 = vsel %vm355_vm0, %v531_v8, %v532_v18 }
  0x40   : > { %v259_v31 = vmul.f32 %v1561_v1, %v245_v22  ;;  %v290_v32 = vmul.f32 %v1566_v2, %v276_v23  ;;  %v333_v33 = vmul.f32 %v1571_v3, %v245_v22  ;;  %v631_v38 = vmul.f32 %v1606_v21, %v617_v10 }
  0x41   : > { %v758_v35 = vmax.f32 %v750_v24, 0.0  ;;  %v561_v37 = vadd.f32 %v533_v30, %v467_v25  ;;  %v334_v39 = vmul.f32 %v1571_v3, %v314_v28  ;;  %v410_v44 = vunpack.c.l.bf16 %v1286_v29 }
  0x42   : > { %v298_v42 = vadd.f32 %v290_v32, %v259_v31  ;;  %v371_v43 = vrot.slane %v333_v33, 1  ;;  %v449_v45 = vunpack.c.h.bf16 %v1286_v29  ;;  %v487_v49 = vunpack.c.l.bf16 %v1304_v34  ;;  %v1303_v32 = vld [vmem:[%s1576_s15 + $0xb4] sm:$0x1] }
  0x43   : > { %v1714_v46 = vmin.f32 %v758_v35, 6.0  ;;  %v600_v47 = vadd.f32 %v592_v15, %v561_v37  ;;  %v372_v48 = vrot.slane %v334_v39, 1  ;;  %v705_v40 = vsel %vm355_vm0, %v703_v20, %v704_v26  ;;  %v1285_v15 = vld [vmem:[%s1576_s15 + $0xb0] ss:$72 sps:$4 sm:$0xff]   ;;  %v1330_v39 = vld [vmem:[%s1576_s15 + $0x2c] sm:$0x1] }
  0x44   : > { %v424_v51 = vmul.f32 %v1581_v4, %v410_v44  ;;  %v506_v52 = vmul.f32 %v1594_v9, %v410_v44  ;;  %v582_v54 = vunpack.c.l.bf16 %v1313_v41  ;;  %v463_v57 = vmul.f32 %v1586_v5, %v449_v45 }
  0x45   : > { %789 = vperm.xlu1 %1395, %v1714_v46   ;;  %v639_v55 = vadd.f32 %v631_v38, %v600_v47  ;;  %v373_v56 = vsel %vm355_vm0, %v371_v43, %v372_v48  ;;  %v507_v58 = vmul.f32 %v1594_v9, %v487_v49  ;;  %v621_v62 = vunpack.c.h.bf16 %v1313_v41  ;;  %v1312_v38 = vld [vmem:[%s1576_s15 + $0x28] ss:$72 sps:$4 sm:$0xff]  }
  0x46   : > { %v393_v60 = vadd.f32 %v373_v56, %v298_v42  ;;  %v543_v61 = vrot.slane %v506_v52, 1  ;;  %v659_v63 = vunpack.c.l.bf16 %v1331_v50  ;;  %v596_v8 = vmul.f32 %v1601_v16, %v582_v54 }
  0x47   : > { %v733_v6 = vadd.f32 %v705_v40, %v639_v55  ;;  %v544_v7 = vrot.slane %v507_v58, 1  ;;  %v678_v10 = vmul.f32 %v1616_v27, %v582_v54  ;;  %v244_v13 = vunpack.c.l.bf16 %v236_v59  ;;  %v239_v54 = vld [vmem:[%s1576_s15 + $0x38] ss:$72 sps:$4 sm:$0xff]  }
  0x48   : > { %v432_v11 = vadd.f32 %v424_v51, %v393_v60  ;;  %v679_v12 = vmul.f32 %v1616_v27, %v659_v63  ;;  %v275_v14 = vunpack.c.h.bf16 %v236_v59  ;;  %v313_v22 = vunpack.c.l.bf16 %v305_v0  ;;  %v308_v59 = vld [vmem:[%s1576_s15 + $0x3c] sm:$0x1] }
  0x49   : > { %v748_v17 = vadd.f32 %v1655_v36, %v733_v6  ;;  %v545_v18 = vsel %vm355_vm0, %v543_v61, %v544_v7  ;;  %v715_v20 = vrot.slane %v678_v10, 1  ;;  %v258_v25 = vmul.f32 %v1561_v1, %v244_v13 }
  0x4a   : > { %v471_v23 = vadd.f32 %v463_v57, %v432_v11  ;;  %v716_v24 = vrot.slane %v679_v12, 1  ;;  %v289_v26 = vmul.f32 %v1566_v2, %v275_v14  ;;  %v331_v29 = vmul.f32 %v1571_v3, %v244_v13  ;;  %v1288_v14 = vld [vmem:[%s1576_s15 + $0xc8] ss:$72 sps:$4 sm:$0xff]  }
  0x4b   : > { %v756_v28 = vmax.f32 %v748_v17, 0.0  ;;  %v332_v30 = vmul.f32 %v1571_v3, %v313_v22  ;;  %v409_v31 = vunpack.c.l.bf16 %v1285_v15  ;;  %v635_v34 = vmul.f32 %v1606_v21, %v621_v62  ;;  %v1306_v22 = vld [vmem:[%s1576_s15 + $0xcc] sm:$0x1] }
  0x4c   : > { %v565_v33 = vadd.f32 %v545_v18, %v471_v23  ;;  %v297_v35 = vadd.f32 %v289_v26, %v258_v25  ;;  %v448_v37 = vunpack.c.h.bf16 %v1285_v15  ;;  %v717_v42 = vsel %vm355_vm0, %v715_v20, %v716_v24 }
  0x4d   : > { %v1740_v41 = vmin.f32 %v756_v28, 6.0  ;;  %v368_v43 = vrot.slane %v331_v29, 1  ;;  %v369_v44 = vrot.slane %v332_v30, 1  ;;  %v423_v47 = vmul.f32 %v1581_v4, %v409_v31 }
  0x4e   : > { %v604_v45 = vadd.f32 %v596_v8, %v565_v33  ;;  %v486_v48 = vunpack.c.l.bf16 %v1303_v32  ;;  %v504_v49 = vmul.f32 %v1594_v9, %v409_v31  ;;  %v462_v40 = vmul.f32 %v1586_v5, %v448_v37  ;;  %v1315_v32 = vld [vmem:[%s1576_s15 + $0x40] ss:$72 sps:$4 sm:$0xff]  }
  0x4f   : > { %779 = vperm.xlu0 %1394, %v1740_v41   ;;  %v370_v50 = vsel %vm355_vm0, %v368_v43, %v369_v44  ;;  %v581_v51 = vunpack.c.l.bf16 %v1312_v38  ;;  %v658_v52 = vunpack.c.l.bf16 %v1330_v39  ;;  %v620_v61 = vunpack.c.h.bf16 %v1312_v38  ;;  %v1333_v38 = vld [vmem:[%s1576_s15 + $0x44] sm:$0x1] }
  0x50   : > { %v643_v55 = vadd.f32 %v635_v34, %v604_v45  ;;  %v392_v56 = vadd.f32 %v370_v50, %v297_v35  ;;  %v505_v57 = vmul.f32 %v1594_v9, %v486_v48  ;;  %v540_v58 = vrot.slane %v504_v49, 1 }
  0x51   : > { %v595_v60 = vmul.f32 %v1601_v16, %v581_v51  ;;  %v676_v62 = vmul.f32 %v1616_v27, %v581_v51  ;;  %v677_v63 = vmul.f32 %v1616_v27, %v658_v52  ;;  %v247_v8 = vunpack.c.l.bf16 %v239_v54 }
  0x52   : > { %v737_v0 = vadd.f32 %v717_v42, %v643_v55  ;;  %v431_v6 = vadd.f32 %v423_v47, %v392_v56  ;;  %v541_v7 = vrot.slane %v505_v57, 1  ;;  %v278_v12 = vunpack.c.h.bf16 %v239_v54  ;;  %v238_v54 = vld [vmem:[%s1576_s15 + $0x30] ss:$72 sps:$4 sm:$0xff]  }
  0x53   : > { %v712_v10 = vrot.slane %v676_v62, 1  ;;  %v713_v11 = vrot.slane %v677_v63, 1  ;;  %v316_v13 = vunpack.c.l.bf16 %v308_v59  ;;  %v261_v20 = vmul.f32 %v1561_v1, %v247_v8  ;;  %v307_v59 = vld [vmem:[%s1576_s15 + $0x34] sm:$0x1] }
  0x54   : > { %v752_v15 = vadd.f32 %v1655_v36, %v737_v0  ;;  %v470_v17 = vadd.f32 %v462_v40, %v431_v6  ;;  %v542_v18 = vsel %vm355_vm0, %v540_v58, %v541_v7  ;;  %v634_v23 = vmul.f32 %v1606_v21, %v620_v61  ;;  %v1287_v0 = vld [vmem:[%s1576_s15 + $0xc0] ss:$72 sps:$4 sm:$0xff]  }
  0x55   : > { %v292_v24 = vmul.f32 %v1566_v2, %v278_v12  ;;  %v337_v25 = vmul.f32 %v1571_v3, %v247_v8  ;;  %v338_v26 = vmul.f32 %v1571_v3, %v316_v13  ;;  %v412_v30 = vunpack.c.l.bf16 %v1288_v14 }
  0x56   : > { %v760_v28 = vmax.f32 %v752_v15, 0.0  ;;  %v564_v29 = vadd.f32 %v542_v18, %v470_v17  ;;  %v451_v31 = vunpack.c.h.bf16 %v1288_v14  ;;  %v489_v37 = vunpack.c.l.bf16 %v1306_v22  ;;  %v1305_v22 = vld [vmem:[%s1576_s15 + $0xc4] sm:$0x1] }
  0x57   : > { %v300_v33 = vadd.f32 %v292_v24, %v261_v20  ;;  %v377_v34 = vrot.slane %v337_v25, 1  ;;  %v378_v35 = vrot.slane %v338_v26, 1  ;;  %v714_v43 = vsel %vm355_vm0, %v712_v10, %v713_v11 }
  0x58   : > { %v1765_v39 = vmin.f32 %v760_v28, 6.0  ;;  %v603_v42 = vadd.f32 %v595_v60, %v564_v29  ;;  %v426_v44 = vmul.f32 %v1581_v4, %v412_v30  ;;  %v510_v47 = vmul.f32 %v1594_v9, %v412_v30  ;;  %v1314_v28 = vld [vmem:[%s1576_s15 + $0x38] ss:$72 sps:$4 sm:$0xff]  }
  0x59   : > { %v379_v45 = vsel %vm355_vm0, %v377_v34, %v378_v35  ;;  %v511_v48 = vmul.f32 %v1594_v9, %v489_v37  ;;  %v584_v49 = vunpack.c.l.bf16 %v1315_v32  ;;  %v465_v51 = vmul.f32 %v1586_v5, %v451_v31 }
  0x5a   : > { %799 = vperm.xlu1 %1395, %v1765_v39   ;;  %v642_v50 = vadd.f32 %v634_v23, %v603_v42  ;;  %v395_v40 = vadd.f32 %v379_v45, %v300_v33  ;;  %v661_v52 = vunpack.c.l.bf16 %v1333_v38  ;;  %v549_v55 = vrot.slane %v510_v47, 1 }
  0x5b   : > { %v550_v56 = vrot.slane %v511_v48, 1  ;;  %v623_v57 = vunpack.c.h.bf16 %v1315_v32  ;;  %v682_v58 = vmul.f32 %v1616_v27, %v584_v49  ;;  %v598_v62 = vmul.f32 %v1601_v16, %v584_v49  ;;  %v1332_v32 = vld [vmem:[%s1576_s15 + $0x3c] sm:$0x1] }
  0x5c   : > { %v736_v60 = vadd.f32 %v714_v43, %v642_v50  ;;  %v434_v61 = vadd.f32 %v426_v44, %v395_v40  ;;  %v683_v63 = vmul.f32 %v1616_v27, %v661_v52  ;;  %v246_v8 = vunpack.c.l.bf16 %v238_v54 }
  0x5d   : > { %v551_v6 = vsel %vm355_vm0, %v549_v55, %v550_v56  ;;  %v721_v7 = vrot.slane %v682_v58, 1  ;;  %v277_v10 = vunpack.c.h.bf16 %v238_v54  ;;  %v315_v14 = vunpack.c.l.bf16 %v307_v59 }
  0x5e   : > { %v751_v11 = vadd.f32 %v1655_v36, %v736_v60  ;;  %v473_v12 = vadd.f32 %v465_v51, %v434_v61  ;;  %v722_v13 = vrot.slane %v683_v63, 1  ;;  %v260_v15 = vmul.f32 %v1561_v1, %v246_v8 }
  0x5f   : > { %v291_v17 = vmul.f32 %v1566_v2, %v277_v10  ;;  %v335_v18 = vmul.f32 %v1571_v3, %v246_v8  ;;  %v411_v20 = vunpack.c.l.bf16 %v1287_v0  ;;  %v637_v25 = vmul.f32 %v1606_v21, %v623_v57 }
  0x60   : > { %v759_v23 = vmax.f32 %v751_v11, 0.0  ;;  %v567_v24 = vadd.f32 %v551_v6, %v473_v12  ;;  %v336_v26 = vmul.f32 %v1571_v3, %v315_v14  ;;  %v450_v31 = vunpack.c.h.bf16 %v1287_v0 }
  0x61   : > { %v299_v29 = vadd.f32 %v291_v17, %v260_v15  ;;  %v374_v30 = vrot.slane %v335_v18, 1  ;;  %v488_v2 = vunpack.c.l.bf16 %v1305_v22  ;;  %v723_v35 = vsel %vm355_vm0, %v721_v7, %v722_v13 }
  0x62   : > { %v1790_v33 = vmin.f32 %v759_v23, 6.0  ;;  %v606_v1 = vadd.f32 %v598_v62, %v567_v24  ;;  %v375_v34 = vrot.slane %v336_v26, 1  ;;  %v425_v37 = vmul.f32 %v1581_v4, %v411_v20 }
  0x63   : > { %v508_v38 = vmul.f32 %v1594_v9, %v411_v20  ;;  %v583_v42 = vunpack.c.l.bf16 %v1314_v28  ;;  %v509_v44 = vmul.f32 %v1594_v9, %v488_v2  ;;  %v660_v45 = vunpack.c.l.bf16 %v1332_v32 }
  0x64   : > { %794 = vperm.xlu0 %1394, %v1790_v33   ;;  %v645_v3 = vadd.f32 %v637_v25, %v606_v1  ;;  %v376_v43 = vsel %vm355_vm0, %v374_v30, %v375_v34  ;;  %v464_v48 = vmul.f32 %v1586_v5, %v450_v31  ;;  %v622_v54 = vunpack.c.h.bf16 %v1314_v28  ;;  %v771_v34 = vld [vmem:[%s1902_s3] sm:$0xf] }
  0x65   : > { %v394_v47 = vadd.f32 %v376_v43, %v299_v29  ;;  %v546_v49 = vrot.slane %v508_v38, 1  ;;  %v547_v40 = vrot.slane %v509_v44, 1  ;;  %v680_v51 = vmul.f32 %v1616_v27, %v583_v42 }
  0x66   : > { %v739_v50 = vadd.f32 %v723_v35, %v645_v3  ;;  %v681_v4 = vmul.f32 %v1616_v27, %v660_v45  ;;  %v597_v9 = vmul.f32 %v1601_v16, %v583_v42  ;;  %v636_v61 = vmul.f32 %v1606_v21, %v622_v54 }
  0x67   : > { %v433_v52 = vadd.f32 %v425_v37, %v394_v47  ;;  %v548_v56 = vsel %vm355_vm0, %v546_v49, %v547_v40  ;;  %v718_v59 = vrot.slane %v680_v51, 1  ;;  %v1465_v7 = vmov 1  }
  0x68   : > { %v754_v55 = vadd.f32 %v1655_v36, %v739_v50  ;;  %v719_v60 = vrot.slane %v681_v4, 1  ;;  %v1466_v21 = vmov 2   ;;  %vm1185_vm6 = vcmask 785408  }
  0x69   : > { %v472_v57 = vadd.f32 %v464_v48, %v433_v52  ;;  %vm1187_vm7 = vcmask 916480  }
  0x6a   : > { %v762_v58 = vmax.f32 %v754_v55, 0.0  ;;  %v720_v27 = vsel %vm355_vm0, %v718_v59, %v719_v60 }
  0x6b   : > { %v566_v5 = vadd.f32 %v548_v56, %v472_v57 }
  0x6c   : > { %v770_v62 = vmin.f32 %v762_v58, 6.0 }
  0x6d   : > { %v605_v63 = vadd.f32 %v597_v9, %v566_v5 }
  0x6e   : > { %809 = vperm.xlu1 %1395, %v770_v62  }
  0x6f   : > { %v644_v0 = vadd.f32 %v636_v61, %v605_v63 }
  0x71   : > { %v738_v6 = vadd.f32 %v720_v27, %v644_v0 }
  0x72   : > { %1397 = vset.pattern.permute.xlu1 %v1465_v7 }
  0x73   : > { %v753_v8 = vadd.f32 %v1655_v36, %v738_v6  ;;  %829 = vperm.xlu1 %1397, %v1740_v41   ;;  %v1467_v36 = vmov 3  }
  0x75   : > { %v761_v16 = vmax.f32 %v753_v8, 0.0 }
  0x77   : > { %v769_v10 = vmin.f32 %v761_v16, 6.0  ;;  %833 = vperm.xlu1 %1397, %v1674_v19  }
  0x79   : > { %804 = vperm.xlu0 %1394, %v769_v10  }
  0x7b   : > { %841 = vperm.xlu1 %1397, %v1790_v33  }
  0x7d   : > { %1396 = vset.pattern.permute.xlu0 %v1465_v7 }
  0x7e   : > { %825 = vperm.xlu0 %1396, %v1690_v53  }
  0x7f   : > { %849 = vperm.xlu1 %1397, %v769_v10  }
  0x82   : > { %837 = vperm.xlu0 %1396, %v1714_v46  }
  0x83   : > { %1398 = vset.pattern.permute.xlu1 %v1466_v21 }
  0x84   : > { %877 = vperm.xlu1 %1398, %v1690_v53  }
  0x86   : > { %845 = vperm.xlu0 %1396, %v1765_v39  }
  0x88   : > { %885 = vperm.xlu1 %1398, %v1674_v19  }
  0x8a   : > { %853 = vperm.xlu0 %1396, %v770_v62  }
  0x8c   : > { %889 = vperm.xlu1 %1398, %v1714_v46  }
  0x8e   : > { %1399 = vset.pattern.permute.xlu0 %v1466_v21 }
  0x8f   : > { %881 = vperm.xlu0 %1399, %v1740_v41  }
  0x90   : > { %897 = vperm.xlu1 %1398, %v1765_v39  }
  0x93   : > { %893 = vperm.xlu0 %1399, %v1790_v33  }
  0x94   : > { %905 = vperm.xlu1 %1398, %v770_v62  }
  0x97   : > { %901 = vperm.xlu0 %1399, %v769_v10  }
  0x98   : > { %1401 = vset.pattern.permute.xlu1 %v1467_v36 }
  0x99   : > { %933 = vperm.xlu1 %1401, %v1740_v41  }
  0x9b   : > { %1400 = vset.pattern.permute.xlu0 %v1467_v36 }
  0x9c   : > { %929 = vperm.xlu0 %1400, %v1690_v53  }
  0x9d   : > { %937 = vperm.xlu1 %1401, %v1674_v19  }
  0xa0   : > { %941 = vperm.xlu0 %1400, %v1714_v46  }
  0xa1   : > { %945 = vperm.xlu1 %1401, %v1790_v33  }
  0xa4   : > { %949 = vperm.xlu0 %1400, %v1765_v39   ;;  %v812_v39 = vlaneseq }
  0xa5   : > { %953 = vperm.xlu1 %1401, %v769_v10  }
  0xa6   : > { %v1829_v29 = vshrl.u32 %v812_v39, 7 }
  0xa8   : > { %957 = vperm.xlu0 %1400, %v770_v62   ;;  %v858_v31 = vsub.s32 1, %v1829_v29  ;;  %v910_v33 = vsub.s32 2, %v1829_v29  ;;  %v814_v2 = vsub.s32 0, %v1829_v29  ;;  %v962_v42 = vsub.s32 3, %v1829_v29 }
  0xaa   : > { %v859_v35 = vrot.slane %v771_v34, %v858_v31  ;;  %v1837_v38 = vrot.slane %v771_v34, %v910_v33  ;;  %v815_v43 = vrot.slane %v771_v34, %v814_v2  ;;  %v1841_v40 = vrot.slane %v771_v34, %v962_v42 }
  0xab   : > { %v1468_v34 = vmov 1983009808  }
  0xac   : > { %v1014_v2 = vunpack.c.l.s4 %v1468_v34 }
  0xaf   : > { %v785_v11 = vpop.permute.xlu1 %784 }
  0xb0   : > { %v818_v54 = vmul.f32 %v815_v43, %v785_v11 }
  0xb6   : > { %v775_v13 = vpop.permute.xlu0 %774 }
  0xb7   : > { %v816_v51 = vmul.f32 %v815_v43, %v775_v13 }
  0xc0   : > { %v790_v12 = vpop.permute.xlu1 %789 }
  0xc1   : > { %v819_v9 = vmul.f32 %v815_v43, %v790_v12 }
  0xca   : > { %v780_v15 = vpop.permute.xlu0 %779 }
  0xcb   : > { %v817_v48 = vmul.f32 %v815_v43, %v780_v15 }
  0xd5   : > { %v800_v14 = vpop.permute.xlu1 %799 }
  0xd6   : > { %v821_v11 = vmul.f32 %v815_v43, %v800_v14 }
  0xdf   : > { %v795_v41 = vpop.permute.xlu0 %794 }
  0xe0   : > { %v820_v5 = vmul.f32 %v815_v43, %v795_v41 }
  0xe9   : > { %v1825_v17 = vpop.permute.xlu1 %809 }
  0xee   : > { %v830_v18 = vpop.permute.xlu1 %829 }
  0xef   : > { %v861_v44 = vmul.f32 %v859_v35, %v830_v18 }
  0xf1   : > { %v869_v55 = vadd.f32 %v861_v44, %v817_v48 }
  0xf2   : > { %v834_v53 = vpop.permute.xlu1 %833 }
  0xf3   : > { %v862_v49 = vmul.f32 %v859_v35, %v834_v53 }
  0xf4   : > { %v805_v20 = vpop.permute.xlu0 %804 }
  0xf5   : > { %v870_v61 = vadd.f32 %v862_v49, %v818_v54  ;;  %v822_v41 = vmul.f32 %v815_v43, %v805_v20 }
  0xf6   : > { %v842_v19 = vpop.permute.xlu1 %841 }
  0xf7   : > { %v864_v60 = vmul.f32 %v859_v35, %v842_v19  ;;  %v1336_v19 = vld [vmem:[%s1903_s4] ss:$0 sm:$0xff] }
  0xf9   : > { %v826_v22 = vpop.permute.xlu0 %825  ;;  %v872_v13 = vadd.f32 %v864_v60, %v820_v5 }
  0xfa   : > { %v850_v46 = vpop.permute.xlu1 %849  ;;  %v860_v45 = vmul.f32 %v859_v35, %v826_v22 }
  0xfb   : > { %v866_v18 = vmul.f32 %v859_v35, %v850_v46 }
  0xfc   : > { %v868_v58 = vadd.f32 %v860_v45, %v816_v51 }
  0xfd   : > { %v838_v23 = vpop.permute.xlu0 %837  ;;  %v874_v42 = vadd.f32 %v866_v18, %v822_v41 }
  0xfe   : > { %v863_v59 = vmul.f32 %v859_v35, %v838_v23 }
  0xff   : > { %v878_v24 = vpop.permute.xlu1 %877 }
 0x100   : > { %v912_v4 = vmul.f32 %v1837_v38, %v878_v24  ;;  %v871_v12 = vadd.f32 %v863_v59, %v819_v9 }
 0x101   : > { %v846_v25 = vpop.permute.xlu0 %845 }
 0x102   : > { %v865_v62 = vmul.f32 %v859_v35, %v846_v25  ;;  %v920_v0 = vadd.f32 %v912_v4, %v868_v58 }
 0x103   : > { %v886_v26 = vpop.permute.xlu1 %885 }
 0x104   : > { %v914_v56 = vmul.f32 %v1837_v38, %v886_v26  ;;  %v873_v24 = vadd.f32 %v865_v62, %v821_v11 }
 0x105   : > { %v1827_v28 = vpop.permute.xlu0 %853 }
 0x106   : > { %v922_v10 = vadd.f32 %v914_v56, %v870_v61  ;;  %v867_v46 = vmul.f32 %v859_v35, %v1827_v28 }
 0x107   : > { %v890_v30 = vpop.permute.xlu1 %889 }
 0x108   : > { %v915_v7 = vmul.f32 %v1837_v38, %v890_v30 }
 0x10a   : > { %v882_v32 = vpop.permute.xlu0 %881  ;;  %v923_v39 = vadd.f32 %v915_v7, %v871_v12  ;;  %v1469_v7 = vmov 1934713408  }
 0x10b   : > { %v898_v1 = vpop.permute.xlu1 %897  ;;  %v913_v50 = vmul.f32 %v1837_v38, %v882_v32 }
 0x10c   : > { %v917_v53 = vmul.f32 %v1837_v38, %v898_v1 }
 0x10d   : > { %v921_v63 = vadd.f32 %v913_v50, %v869_v55 }
 0x10e   : > { %v894_v37 = vpop.permute.xlu0 %893  ;;  %v925_v44 = vadd.f32 %v917_v53, %v873_v24 }
 0x10f   : > { %v906_v3 = vpop.permute.xlu1 %905  ;;  %v916_v6 = vmul.f32 %v1837_v38, %v894_v37  ;;  %v823_v37 = vmul.f32 %v815_v43, %v1825_v17 }
 0x110   : > { %v919_v49 = vmul.f32 %v1837_v38, %v906_v3  ;;  %v1015_v3 = vunpack.c.0.s8 %v1014_v2 }
 0x111   : > { %v924_v25 = vadd.f32 %v916_v6, %v872_v13  ;;  %v875_v55 = vadd.f32 %v867_v46, %v823_v37 }
 0x112   : > { %v902_v47 = vpop.permute.xlu0 %901 }
 0x113   : > { %v918_v14 = vmul.f32 %v1837_v38, %v902_v47  ;;  %v927_v58 = vadd.f32 %v919_v49, %v875_v55 }
 0x114   : > { %v934_v52 = vpop.permute.xlu1 %933 }
 0x115   : > { %v965_v57 = vmul.f32 %v1841_v40, %v934_v52  ;;  %v926_v52 = vadd.f32 %v918_v14, %v874_v42 }
 0x117   : > { %v930_v27 = vpop.permute.xlu0 %929  ;;  %v973_v21 = vadd.f32 %v965_v57, %v921_v63 }
 0x118   : > { %v964_v8 = vmul.f32 %v1841_v40, %v930_v27  ;;  %v938_v16 = vpop.permute.xlu1 %937 }
 0x119   : > { %v966_v36 = vmul.f32 %v1841_v40, %v938_v16  ;;  %v988_v31 = vadd.f32 %v1336_v19, %v973_v21 }
 0x11a   : > { %v972_v15 = vadd.f32 %v964_v8, %v920_v0  ;;  %v1078_v8 = vunpack.c.l.s4 %v1469_v7 }
 0x11b   : > { %v942_v22 = vpop.permute.xlu0 %941  ;;  %v974_v23 = vadd.f32 %v966_v36, %v922_v10  ;;  %v996_v54 = vmax.f32 %v988_v31, 0.0  ;;  %v1018_v36 = vsub.s32 %v1015_v3, %v1829_v29 }
 0x11c   : > { %v967_v26 = vmul.f32 %v1841_v40, %v942_v22  ;;  %v946_v30 = vpop.permute.xlu1 %945  ;;  %v987_v33 = vadd.f32 %v1336_v19, %v972_v15  ;;  %v1079_v53 = vunpack.c.0.s8 %v1078_v8 }
 0x11d   : > { %v989_v32 = vadd.f32 %v1336_v19, %v974_v23  ;;  %v968_v20 = vmul.f32 %v1841_v40, %v946_v30  ;;  %v1004_v5 = vmin.f32 %v996_v54, 6.0 }
 0x11e   : > { %v975_v1 = vadd.f32 %v967_v26, %v923_v39  ;;  %v995_v56 = vmax.f32 %v987_v33, 0.0 }
 0x11f   : > { %v950_v45 = vpop.permute.xlu0 %949  ;;  %v976_v48 = vadd.f32 %v968_v20, %v924_v25  ;;  %v997_v51 = vmax.f32 %v989_v32, 0.0  ;;  %v1082_v32 = vsub.s32 %v1079_v53, %v1829_v29 }
 0x120   : > { %v990_v50 = vadd.f32 %v1336_v19, %v975_v1  ;;  %v969_v47 = vmul.f32 %v1841_v40, %v950_v45  ;;  %v954_v4 = vpop.permute.xlu1 %953  ;;  %v1003_v63 = vmin.f32 %v995_v56, 6.0 }
 0x121   : > { %v991_v28 = vadd.f32 %v1336_v19, %v976_v48  ;;  %v970_v35 = vmul.f32 %v1841_v40, %v954_v4  ;;  %v1005_v60 = vmin.f32 %v997_v51, 6.0 }
 0x122   : > { %v977_v57 = vadd.f32 %v969_v47, %v925_v44  ;;  %v998_v17 = vmax.f32 %v990_v50, 0.0 }
 0x123   : > { %v958_v43 = vpop.permute.xlu0 %957  ;;  %v978_v9 = vadd.f32 %v970_v35, %v926_v52  ;;  %v999_v61 = vmax.f32 %v991_v28, 0.0  ;;  %v1011_v10 = vcombine.low %v1003_v63, %v1005_v60 }
 0x124   : > { %v992_v59 = vadd.f32 %v1336_v19, %v977_v57  ;;  %v971_v38 = vmul.f32 %v1841_v40, %v958_v43  ;;  %v1006_v0 = vmin.f32 %v998_v17, 6.0  ;;  %v1012_v40 = vcombine.high %v1003_v63, %v1005_v60 }
 0x125   : > { %v993_v62 = vadd.f32 %v1336_v19, %v978_v9  ;;  %v1007_v12 = vmin.f32 %v999_v61, 6.0  ;;  %v1019_v23 = vrot.slane %v1011_v10, %v1018_v36 }
 0x126   : > { %v979_v27 = vadd.f32 %v971_v38, %v927_v58  ;;  %v1000_v16 = vmax.f32 %v992_v59, 0.0  ;;  %v1027_v11 = vcombine.low %v1004_v5, %v1006_v0  ;;  %v1028_v25 = vcombine.high %v1004_v5, %v1006_v0 }
 0x127   : > { %v1001_v6 = vmax.f32 %v993_v62, 0.0 }
 0x128   : > { %v994_v21 = vadd.f32 %v1336_v19, %v979_v27  ;;  %v1008_v22 = vmin.f32 %v1000_v16, 6.0  ;;  %v1035_v39 = vrot.slane %v1027_v11, %v1018_v36  ;;  %v1026_v19 = vrot.slane %v1012_v40, %v1018_v36 }
 0x129   : > { %v1009_v13 = vmin.f32 %v1001_v6, 6.0  ;;  %v1042_v34 = vrot.slane %v1028_v25, %v1018_v36 }
 0x12a   : > { %v1002_v15 = vmax.f32 %v994_v21, 0.0  ;;  %v1076_v33 = vcombine.high %v1019_v23, %v1035_v39  ;;  %v1075_v1 = vcombine.low %v1019_v23, %v1035_v39 }
 0x12b   : > { %v1043_v41 = vcombine.low %v1007_v12, %v1009_v13  ;;  %v1044_v18 = vcombine.high %v1007_v12, %v1009_v13  ;;  %v1091_v44 = vcombine.low %v1026_v19, %v1042_v34  ;;  %v1092_v28 = vcombine.high %v1026_v19, %v1042_v34 }
 0x12c   : > { %v1010_v24 = vmin.f32 %v1002_v15, 6.0  ;;  %v1090_v45 = vrot.slane %v1076_v33, %v1082_v32  ;;  %v1083_v49 = vrot.slane %v1075_v1, %v1082_v32 }
 0x12d   : > { %v1051_v14 = vrot.slane %v1043_v41, %v1018_v36  ;;  %v1058_v31 = vrot.slane %v1044_v18, %v1018_v36  ;;  %v1099_v29 = vrot.slane %v1091_v44, %v1082_v32  ;;  %v1106_v57 = vrot.slane %v1092_v28, %v1082_v32 }
 0x12e   : > { %v1059_v26 = vcombine.low %v1008_v22, %v1010_v24  ;;  %v1060_v30 = vcombine.high %v1008_v22, %v1010_v24 }
 0x130   : > { %v1067_v20 = vrot.slane %v1059_v26, %v1018_v36  ;;  %v1074_v46 = vrot.slane %v1060_v30, %v1018_v36 }
 0x132   : > { %v1108_v2 = vcombine.high %v1051_v14, %v1067_v20  ;;  %v1107_v37 = vcombine.low %v1051_v14, %v1067_v20  ;;  %v1123_v42 = vcombine.low %v1058_v31, %v1074_v46  ;;  %v1124_v52 = vcombine.high %v1058_v31, %v1074_v46 }
 0x134   : > { %v1122_v48 = vrot.slane %v1108_v2, %v1082_v32  ;;  %v1115_v50 = vrot.slane %v1107_v37, %v1082_v32  ;;  %v1131_v4 = vrot.slane %v1123_v42, %v1082_v32  ;;  %v1138_v56 = vrot.slane %v1124_v52, %v1082_v32 }
 0x136   : > { %v1141_v47 = vcombine.low %v1090_v45, %v1122_v48  ;;  %v1140_v51 = vcombine.high %v1083_v49, %v1115_v50  ;;  %v1139_v54 = vcombine.low %v1083_v49, %v1115_v50  ;;  %v1143_v35 = vcombine.low %v1099_v29, %v1131_v4 }
 0x137   : > { %v1142_v55 = vcombine.high %v1090_v45, %v1122_v48  ;;  %v1145_v17 = vcombine.low %v1106_v57, %v1138_v56  ;;  %v1144_v43 = vcombine.high %v1099_v29, %v1131_v4  ;;  %v1146_v9 = vcombine.high %v1106_v57, %v1138_v56 }
 0x138   : > { %1152 = vrot.lane.b32.xlu0 %v1141_v47, %s1470_s23  ;;  %1148 = vrot.lane.b32.xlu1 %v1140_v51, %s1471_s25  ;;  %s1402_s23 = scalar_lea.vmem %s1206_s13, 64  ;;  %s1477_s25 = smov [#allocation2]  }
 0x139   : > { %p1403_p11 = scmp.ne.s32.totalorder %s1206_s13, %s1402_s23  ;;  %s1406_s22 = sshll.u32 %s1477_s25, 4  ;;  %s1407_s22 = int_to_ptr.vmem [resolvable:$false] %s1406_s22 }
 0x13a   : > { %p1409_p0 = scmp.lt.s32.totalorder %s1206_s13, %s1407_s22 }
 0x13b   : > { %p1404_p12 = pnand %p1403_p11, %p1546_p5 }
 0x13c   : > { %1160 = vrot.lane.b32.xlu0 %v1143_v35, %s1472_s26  ;;  %1156 = vrot.lane.b32.xlu1 %v1142_v55, %s1473_s30  ;;  %s1408_s26 = scalar_lea.vmem %s1407_s22, 128 }
 0x13d   : > { %p1405_p13 = pneg %p1404_p12  ;;  %p1410_p1 = scmp.lt.s32.totalorder %s1408_s26, %s1402_s23 }
 0x13f   : > { %p1411_p2 = por %p1410_p1, %p1409_p0 }
 0x140   : > { %1168 = vrot.lane.b32.xlu0 %v1145_v17, %s1474_s6  ;;  %1164 = vrot.lane.b32.xlu1 %v1144_v43, %s1475_s7 }
 0x141   : > { %p1412_p3 = pnand %p1411_p2, %p1405_p13 }
 0x144   : > { %1172 = vrot.lane.b32.xlu1 %v1146_v9, %s1476_s8 }
 0x1aa   : > { %v1153_v58 = vpop.permute.xlu0 %1152  ;;  %v1149_v59 = vpop.permute.xlu1 %1148 }
 0x1ab   : > { %v1176_v60 = vsel %vm1175_vm1, %v1139_v54, %v1149_v59 }
 0x1ac   : > { %v1178_v5 = vsel %vm1177_vm2, %v1176_v60, %v1153_v58 }
 0x1ae   : > { %v1161_v38 = vpop.permute.xlu0 %1160  ;;  %v1157_v3 = vpop.permute.xlu1 %1156 }
 0x1af   : > { %v1180_v61 = vsel %vm1179_vm3, %v1178_v5, %v1157_v3 }
 0x1b0   : > { %v1182_v63 = vsel %vm1181_vm4, %v1180_v61, %v1161_v38 }
 0x1b2   : > { %v1165_v62 = vpop.permute.xlu1 %1164  ;;  %v1169_v27 = vpop.permute.xlu0 %1168 }
 0x1b3   : > { %v1184_v0 = vsel %vm1183_vm5, %v1182_v63, %v1165_v62 }
 0x1b4   : > { %v1186_v7 = vsel %vm1185_vm6, %v1184_v0, %v1169_v27 }
 0x1b6   : > { %v1173_v6 = vpop.permute.xlu1 %1172 }
 0x1b7   : > { %v1188_v8 = vsel %vm1187_vm7, %v1186_v7, %v1173_v6 }
 0x1b8   : > { %v1189_v16 = vpack.c.bf16 %v1188_v8, %v1188_v8 }
 0x1ba   : > { %1190 = vst [vmem:[%s217_s12] sm:$0xf] %v1189_v16 }
 0x1bb   : > { %1415 = shalt.err (!%p1412_p3)
}
 0x1bc   : > { %s1416_s30 = scalar_lea.hbm %s1203_s16, 64  ;;  %s1420_s8 = scalar_lea.hbm %s1904_s5, 128 }
 0x1bd   : > { %p1417_p4 = scmp.ne.s32.totalorder %s1203_s16, %s1416_s30  ;;  %p1421_p9 = scmp.lt.s32.totalorder %s1203_s16, %s1904_s5 }
 0x1be   : > { %p1422_p10 = scmp.lt.s32.totalorder %s1420_s8, %s1416_s30 }
 0x1bf   : > { %p1418_p7 = pnand %p1417_p4, %p1546_p5 }
 0x1c0   : > { %p1423_p11 = por %p1422_p10, %p1421_p9 }
 0x1c1   : > { %p1419_p8 = pneg %p1418_p7 }
 0x1c3   : > { %p1424_p12 = pnand %p1423_p11, %p1419_p8 }
 0x1c5   : > { %1427 = shalt.err (!%p1424_p12)
}
 0x1c6   : > { %1342 = dma.vmem_to_hbm [thread:$0]  (%p1546_p5), %s1206_s13, 64, %s1203_s16, %s1192_s17  }
 0x1c7 PF: > { %p1348_p13 = scmp.ge.s32.totalorder %s1462_s21, 2  ;;  %s1217_s11 = sand.u32 1, %s1450_s18  }
 0x1c8   : > { %s1218_s12 = scalar_lea.sflag [#allocation3], %s1217_s11 }
 0x1c9   : > { %p1345_p0 = pnand %p1348_p13, %p1550_p6 }
 0x1cb   : > { %p1346_p1 = pneg %p1345_p0 }
 0x1cd   : > { %1445 = dma.done.wait (%p1346_p1), %s1218_s12, 64  }
 0x1ce   : > { %1447 = vsyncadd (%p1346_p1), %s1218_s12, 4294967232  ;;  %p15_p2 = scmp.ge.s32.totalorder %s1533_s24, 4   ;;  %s1907_s18 = smov %s1454_s19 }
 0x1cf   : > { %s1908_s19 = smov %s1458_s20  ;;  %s1909_s20 = smov %s1544_s27 }
 0x1d0   : > { %s1910_s21 = smov %s1533_s24  ;;  %17 = sbr.rel (!%p15_p2) target bundleno = 3 (0x3), region = 80 }
 0x1d5   :  { %1223 = vsyncpa [#allocation3], 1 }
 0x1d6   :  { %1225 = vsyncpa [#allocation3 + $0x1], 1 }

</bundles_post_ra>
